<compile_context>
chip_gen: v6e
topology: v6e:2x2x1
jax: 0.10.0
libtpu: 0.0.40
codegen_flags: <defaults>
</compile_context>

<pallas_src>
import numpy as np
import jax
import jax.numpy as jnp
from jax.experimental import pallas as pl
from jax.experimental.pallas import tpu as pltpu

_EPS = 1e-5


# --------------------------------------------------------------------------- #
# Host-side parameter packing: everything the kernel needs, in ONE f32 slab of
# shape (rows, N*H*W).  Static row offsets are returned and baked into the
# kernel as Python constants.
# --------------------------------------------------------------------------- #
def _pack_params(P, N, Cin, H, W):
    HW = H * W
    NHW = N * HW

    lane = np.arange(NHW)
    hw = lane % HW
    ri = hw // W            # spatial row of each lane (lane = n*HW + i*W + j)
    ci = hw % W             # spatial col of each lane

    w1 = np.asarray(P['w1'], np.float32).reshape(-1)
    w3a = np.asarray(P['w3a'], np.float32).reshape(-1)
    w5a = np.asarray(P['w5a'], np.float32).reshape(-1)
    wp = np.asarray(P['wp'], np.float32).reshape(-1)
    w3b = np.asarray(P['w3b'], np.float32).reshape(3, 3)
    w5b = np.asarray(P['w5b'], np.float32).reshape(5, 5)
    b = {k: float(np.asarray(P[k]).reshape(-1)[0])
         for k in ('b1', 'b3a', 'b3b', 'b5a', 'b5b', 'bp', 'bfc')}
    g = np.asarray(P['bn_gamma'], np.float32).reshape(6)
    bt = np.asarray(P['bn_beta'], np.float32).reshape(6)
    wfc = np.asarray(P['wfc'], np.float32).reshape(4, HW)   # [o1, o3, o5, opool]

    blocks, offs = [], {}

    def add(name, blk):
        offs[name] = sum(x.shape[0] for x in blocks)
        blocks.append(np.ascontiguousarray(blk, np.float32))

    def colblk(vals):
        blk = np.zeros((len(vals), NHW), np.float32)
        blk[:, 0] = vals
        return blk

    # MXU lhs blocks (weights in lanes [0:Cin]).  Stage-A row order:
    #   [t3_pre, t5_pre, out1x1_pre, out_pool_pre, 0, 0, 0, 0]
    wx = np.zeros((8, NHW), np.float32)
    wx[0, :Cin], wx[1, :Cin], wx[2, :Cin] = w3a, w5a, w1
    wpool = np.zeros((8, NHW), np.float32)
    wpool[3, :Cin] = wp
    add('w_x', wx)
    add('w_pool', wpool)

    # BN/bias columns (lane 0 only is read in-kernel).
    add('bias_a', colblk([b['b3a'], b['b5a'], b['b1'], b['bp'], 0, 0, 0, 0]))
    add('gamma_a', colblk([g[1], g[3], g[0], g[5], 0, 0, 0, 0]))
    add('beta_a', colblk([bt[1], bt[3], bt[0], bt[5], 0, 0, 0, 0]))
    add('bias_b', colblk([b['b3b'], b['b5b']]))
    add('gamma_b', colblk([g[2], g[4]]))
    add('beta_b', colblk([bt[2], bt[4]]))
    add('bias_fc', colblk([b['bfc']]))

    # 3x3 max-pool: additive -inf edge masks for the 8 off-centre taps,
    # pre-broadcast over the Cin sublane rows of the stacked input.
    pm = []
    for di in range(3):
        for dj in range(3):
            if di == 1 and dj == 1:
                continue
            si, sj = di - 1, dj - 1
            valid = (ri + si >= 0) & (ri + si < H) & (ci + sj >= 0) & (ci + sj < W)
            row = np.where(valid, 0.0, -np.inf).astype(np.float32)
            pm.append(np.broadcast_to(row, (Cin, NHW)))
    add('pmask', np.concatenate(pm, axis=0))              # (8*Cin, NHW)

    # Shared 3x3 / 5x5 conv taps: per tap a (2, NHW) block = [w3b row, w5b row]
    # with the zero-padding edge mask folded into the weights.
    ws = []
    for di in range(5):
        for dj in range(5):
            si, sj = di - 2, dj - 2
            valid = ((ri + si >= 0) & (ri + si < H) &
                     (ci + sj >= 0) & (ci + sj < W)).astype(np.float32)
            w3 = w3b[di - 1, dj - 1] if (1 <= di <= 3 and 1 <= dj <= 3) else 0.0
            ws.append(np.stack([valid * w3, valid * w5b[di, dj]], axis=0))
    add('wsp', np.concatenate(ws, axis=0))                 # (50, NHW)

    # FC weights tiled per sample so lane n*HW+hw carries wfc[channel, hw]
    # (NCHW flatten order: [o1, o3, o5, o_pool]).
    fa = np.zeros((8, NHW), np.float32)
    fa[2] = np.tile(wfc[0], N)      # branch1x1 output row of the stage-A stack
    fa[3] = np.tile(wfc[3], N)      # pool-branch output row
    add('wfc_a', fa)
    add('wfc_b', np.stack([np.tile(wfc[1], N), np.tile(wfc[2], N)], axis=0))

    return jnp.asarray(np.concatenate(blocks, axis=0)), offs


# --------------------------------------------------------------------------- #
# Kernel
# --------------------------------------------------------------------------- #
def _make_kernel(N, Cin, H, W, offs):
    HW = H * W
    NHW = N * HW
    inv_count = 1.0 / float(NHW)     # per-channel BN count = N*H*W (Cm == 1)

    def bn_relu(y, gamma, beta):
        # Training-mode BatchNorm2d + ReLU, one pair of row-wise lane reductions
        # covers every channel in the stack (per-row stats = per-channel stats).
        s1 = jnp.sum(y, axis=1, keepdims=True)
        s2 = jnp.sum(y * y, axis=1, keepdims=True)
        mu = s1 * inv_count
        var = jnp.maximum(s2 * inv_count - mu * mu, 0.0)
        scale = gamma * jax.lax.rsqrt(var + _EPS)
        shift = beta - mu * scale
        return jnp.maximum(y * scale + shift, 0.0)

    def kernel(x_ref, p_ref, out_ref):
        def rows(name, n, extra=0):
            r0 = offs[name] + extra
            return p_ref[r0:r0 + n, :]

        def col(name, n):
            r0 = offs[name]
            return p_ref[r0:r0 + n, 0:1]

        x = x_ref[...]                                       # (Cin, N*HW)

        # ---- branch_pool: 3x3 stride-1 max-pool on all Cin channels at once ----
        # 8 rolls total (was 32); -inf edge handling is a host-packed additive mask.
        pooled = x
        t = 0
        for di in range(3):
            for dj in range(3):
                if di == 1 and dj == 1:
                    continue
                s = (di - 1) * W + (dj - 1)
                tap = pltpu.roll(x, shift=(-s) % NHW, axis=1)
                pooled = jnp.maximum(pooled, tap + rows('pmask', Cin, t * Cin))
                t += 1

        # ---- all four branch 1x1 convs: two tiny MXU matmuls (MXU is idle) ----
        wx = p_ref[offs['w_x']:offs['w_x'] + 8, 0:Cin]       # (8, Cin)
        wpool = p_ref[offs['w_pool']:offs['w_pool'] + 8, 0:Cin]
        y = (jnp.dot(wx, x, preferred_element_type=jnp.float32) +
             jnp.dot(wpool, pooled, preferred_element_type=jnp.float32) +
             col('bias_a', 8))
        # rows: [t3_pre, t5_pre, o1_pre, o_pool_pre, 0, 0, 0, 0]
        a = bn_relu(y, col('gamma_a', 8), col('beta_a', 8))  # (8, NHW)

        # ---- shared 3x3 / 5x5 conv on the stacked [t3; t5] rows --------------
        # 24 rolls total (was 32); padding mask is folded into the tap weights,
        # so no in-kernel masks / iotas / selects at all.
        s35 = a[0:2, :]                                      # (2, NHW)
        acc = None
        for di in range(5):
            for dj in range(5):
                s = (di - 2) * W + (dj - 2)
                tap = s35 if s == 0 else pltpu.roll(s35, shift=(-s) % NHW, axis=1)
                term = tap * rows('wsp', 2, 2 * (di * 5 + dj))
                acc = term if acc is None else acc + term
        yb = acc + col('bias_b', 2)
        bo = bn_relu(yb, col('gamma_b', 2), col('beta_b', 2))  # (2,NHW) = [o3; o5]

        # ---- Linear(4*HW -> 1) + sigmoid without materializing the concat ----
        wa = a * rows('wfc_a', 8)       # only the o1 / o_pool rows are non-zero
        wb = bo * rows('wfc_b', 2)
        parts = []
        for n in range(N):
            lo, hi = n * HW, (n + 1) * HW      # 128-aligned lane blocks
            sa = jnp.sum(jnp.sum(wa[:, lo:hi], axis=1, keepdims=True),
                         axis=0, keepdims=True)
            sb = jnp.sum(jnp.sum(wb[:, lo:hi], axis=1, keepdims=True),
                         axis=0, keepdims=True)
            parts.append(sa + sb)
        logit = jnp.concatenate(parts, axis=0) + col('bias_fc', 1)   # (N, 1)

        e = jnp.exp(-jnp.abs(logit))            # overflow-free sigmoid
        pos = 1.0 / (1.0 + e)
        out_ref[...] = jnp.where(logit >= 0.0, pos, 1.0 - pos)

    return kernel


# --------------------------------------------------------------------------- #
# Wrapper
# --------------------------------------------------------------------------- #
def inception_forward(x, P):
    N, Cin, H, W = x.shape
    Cm = P['w1'].shape[0]
    # TODO(synk): kernel is specialized to the module default out_channels=4
    # (one channel per branch); generalizing needs per-co stacked weight slabs.
    assert Cm == 1, "kernel specialized for out_channels == 4 (Cm == 1)"

    HW = H * W
    f32 = jnp.float32

    # lane-dense channel-major layout: each channel is one (N*H*W) lane row.
    x2 = jnp.transpose(x, (1, 0, 2, 3)).reshape(Cin, N * HW).astype(f32)
    packed, offs = _pack_params(P, N, Cin, H, W)

    vmem = pl.BlockSpec(memory_space=pltpu.MemorySpace.VMEM)
    return pl.pallas_call(
        _make_kernel(N, Cin, H, W, offs),
        out_shape=jax.ShapeDtypeStruct((N, 1), f32),
        in_specs=[vmem, vmem],          # 2 input DMAs (was 17)
        out_specs=vmem,
    )(x2, packed)


# --------------------------------------------------------------------------- #
# Parameters / reference
# --------------------------------------------------------------------------- #
def init_params(key, in_channels, out_channels, H, W):
    Cm = out_channels // 4
    ks = jax.random.split(key, 17)

    def w(k, shape, scale):
        return scale * jax.random.normal(k, shape, jnp.float32)

    return {
        'w1':  w(ks[0], (Cm, in_channels, 1, 1), 0.3), 'b1':  w(ks[1], (Cm,), 0.1),
        'w3a': w(ks[2], (Cm, in_channels, 1, 1), 0.3), 'b3a': w(ks[3], (Cm,), 0.1),
        'w3b': w(ks[4], (Cm, Cm, 3, 3), 0.3),          'b3b': w(ks[5], (Cm,), 0.1),
        'w5a': w(ks[6], (Cm, in_channels, 1, 1), 0.3), 'b5a': w(ks[7], (Cm,), 0.1),
        'w5b': w(ks[8], (Cm, Cm, 5, 5), 0.3),          'b5b': w(ks[9], (Cm,), 0.1),
        'wp':  w(ks[10], (Cm, in_channels, 1, 1), 0.3), 'bp': w(ks[11], (Cm,), 0.1),
        'bn_gamma': 1.0 + w(ks[12], (6, Cm), 0.1),
        'bn_beta':  w(ks[13], (6, Cm), 0.1),
        'wfc': w(ks[14], (1, 4 * Cm * H * W), 0.05),
        'bfc': w(ks[15], (1,), 0.1),
    }


def reference_forward(x, P):
    """Plain-JAX reference mirroring the PyTorch forward semantics."""
    hi = jax.lax.Precision.HIGHEST

    def conv(inp, w, b, pad):
        y = jax.lax.conv_general_dilated(
            inp, w, window_strides=(1, 1),
            padding=((pad, pad), (pad, pad)),
            dimension_numbers=('NCHW', 'OIHW', 'NCHW'),
            precision=hi)
        return y + b.reshape(1, -1, 1, 1)

    def bn_relu(y, g, b):
        mu = jnp.mean(y, axis=(0, 2, 3), keepdims=True)
        var = jnp.mean((y - mu) ** 2, axis=(0, 2, 3), keepdims=True)
        yn = (y - mu) * jax.lax.rsqrt(var + _EPS)
        return jnp.maximum(yn * g.reshape(1, -1, 1, 1) + b.reshape(1, -1, 1, 1), 0.0)

    g, bb = P['bn_gamma'], P['bn_beta']
    o1 = bn_relu(conv(x, P['w1'], P['b1'], 0), g[0], bb[0])
    t = bn_relu(conv(x, P['w3a'], P['b3a'], 0), g[1], bb[1])
    o3 = bn_relu(conv(t, P['w3b'], P['b3b'], 1), g[2], bb[2])
    t = bn_relu(conv(x, P['w5a'], P['b5a'], 0), g[3], bb[3])
    o5 = bn_relu(conv(t, P['w5b'], P['b5b'], 2), g[4], bb[4])
    pooled = jax.lax.reduce_window(x, -jnp.inf, jax.lax.max,
                                   (1, 1, 3, 3), (1, 1, 1, 1),
                                   ((0, 0), (0, 0), (1, 1), (1, 1)))
    op = bn_relu(conv(pooled, P['wp'], P['bp'], 0), g[5], bb[5])
    feat = jnp.concatenate([o1, o3, o5, op], axis=1).reshape(x.shape[0], -1)
    logit = jnp.dot(feat, P['wfc'].T, precision=hi) + P['bfc']
    return jax.nn.sigmoid(logit)


if __name__ == "__main__":
    N, Cin, H, W = 2, 4, 16, 16
    out_channels = 4   # module default -> each branch has out_channels // 4 = 1 channel

    key = jax.random.PRNGKey(0)
    kx, kp = jax.random.split(key)
    x = jax.random.normal(kx, (N, Cin, H, W), jnp.float32)
    P = init_params(kp, Cin, out_channels, H, W)

    y = inception_forward(x, P)
    y = jax.block_until_ready(y)

    y_ref = reference_forward(x, P)
    assert y.shape == (N, 1)
    assert bool(jnp.all(jnp.isfinite(y)))
    if not jnp.allclose(y, y_ref, atol=2e-4, rtol=2e-4):
        raise SystemExit(f"MISMATCH: pallas={y.tolist()} ref={y_ref.tolist()}")

    print("KERNEL_OK")
</pallas_src>

<mosaic_0001>
module attributes {stable_mosaic.version = 11 : i64} {
  func.func @kernel(%arg0: memref<4x512xf32, #tpu.memory_space<vmem>>, %arg1: memref<139x512xf32, #tpu.memory_space<vmem>>, %arg2: memref<2x1xf32, #tpu.memory_space<vmem>>) attributes {dimension_semantics = [], scalar_prefetch = 0 : i64, scratch_operands = 0 : i64, tpu.core_type = #tpu.core_type<tc>} {
    %c0 = arith.constant 0 : index
    %c0_0 = arith.constant 0 : index
    %0 = vector.load %arg0[%c0, %c0_0] : memref<4x512xf32, #tpu.memory_space<vmem>>, vector<4x512xf32>
    %c17_i32 = arith.constant 17 : i32
    %1 = tpu.dynamic_rotate %0 by %c17_i32 dim 1 : vector<4x512xf32>, i32 -> vector<4x512xf32>
    %c47 = arith.constant 47 : index
    %c0_1 = arith.constant 0 : index
    %2 = vector.load %arg1[%c47, %c0_1] : memref<139x512xf32, #tpu.memory_space<vmem>>, vector<4x512xf32>
    %3 = arith.addf %1, %2 : vector<4x512xf32>
    %4 = arith.maximumf %0, %3 : vector<4x512xf32>
    %c16_i32 = arith.constant 16 : i32
    %5 = tpu.dynamic_rotate %0 by %c16_i32 dim 1 : vector<4x512xf32>, i32 -> vector<4x512xf32>
    %c51 = arith.constant 51 : index
    %c0_2 = arith.constant 0 : index
    %6 = vector.load %arg1[%c51, %c0_2] : memref<139x512xf32, #tpu.memory_space<vmem>>, vector<4x512xf32>
    %7 = arith.addf %5, %6 : vector<4x512xf32>
    %8 = arith.maximumf %4, %7 : vector<4x512xf32>
    %c15_i32 = arith.constant 15 : i32
    %9 = tpu.dynamic_rotate %0 by %c15_i32 dim 1 : vector<4x512xf32>, i32 -> vector<4x512xf32>
    %c55 = arith.constant 55 : index
    %c0_3 = arith.constant 0 : index
    %10 = vector.load %arg1[%c55, %c0_3] : memref<139x512xf32, #tpu.memory_space<vmem>>, vector<4x512xf32>
    %11 = arith.addf %9, %10 : vector<4x512xf32>
    %12 = arith.maximumf %8, %11 : vector<4x512xf32>
    %c1_i32 = arith.constant 1 : i32
    %13 = tpu.dynamic_rotate %0 by %c1_i32 dim 1 : vector<4x512xf32>, i32 -> vector<4x512xf32>
    %c59 = arith.constant 59 : index
    %c0_4 = arith.constant 0 : index
    %14 = vector.load %arg1[%c59, %c0_4] : memref<139x512xf32, #tpu.memory_space<vmem>>, vector<4x512xf32>
    %15 = arith.addf %13, %14 : vector<4x512xf32>
    %16 = arith.maximumf %12, %15 : vector<4x512xf32>
    %c511_i32 = arith.constant 511 : i32
    %17 = tpu.dynamic_rotate %0 by %c511_i32 dim 1 : vector<4x512xf32>, i32 -> vector<4x512xf32>
    %c63 = arith.constant 63 : index
    %c0_5 = arith.constant 0 : index
    %18 = vector.load %arg1[%c63, %c0_5] : memref<139x512xf32, #tpu.memory_space<vmem>>, vector<4x512xf32>
    %19 = arith.addf %17, %18 : vector<4x512xf32>
    %20 = arith.maximumf %16, %19 : vector<4x512xf32>
    %c497_i32 = arith.constant 497 : i32
    %21 = tpu.dynamic_rotate %0 by %c497_i32 dim 1 : vector<4x512xf32>, i32 -> vector<4x512xf32>
    %c67 = arith.constant 67 : index
    %c0_6 = arith.constant 0 : index
    %22 = vector.load %arg1[%c67, %c0_6] : memref<139x512xf32, #tpu.memory_space<vmem>>, vector<4x512xf32>
    %23 = arith.addf %21, %22 : vector<4x512xf32>
    %24 = arith.maximumf %20, %23 : vector<4x512xf32>
    %c496_i32 = arith.constant 496 : i32
    %25 = tpu.dynamic_rotate %0 by %c496_i32 dim 1 : vector<4x512xf32>, i32 -> vector<4x512xf32>
    %c71 = arith.constant 71 : index
    %c0_7 = arith.constant 0 : index
    %26 = vector.load %arg1[%c71, %c0_7] : memref<139x512xf32, #tpu.memory_space<vmem>>, vector<4x512xf32>
    %27 = arith.addf %25, %26 : vector<4x512xf32>
    %28 = arith.maximumf %24, %27 : vector<4x512xf32>
    %c495_i32 = arith.constant 495 : i32
    %29 = tpu.dynamic_rotate %0 by %c495_i32 dim 1 : vector<4x512xf32>, i32 -> vector<4x512xf32>
    %c75 = arith.constant 75 : index
    %c0_8 = arith.constant 0 : index
    %30 = vector.load %arg1[%c75, %c0_8] : memref<139x512xf32, #tpu.memory_space<vmem>>, vector<4x512xf32>
    %31 = arith.addf %29, %30 : vector<4x512xf32>
    %32 = arith.maximumf %28, %31 : vector<4x512xf32>
    %c0_9 = arith.constant 0 : index
    %c0_10 = arith.constant 0 : index
    %33 = vector.load %arg1[%c0_9, %c0_10] : memref<139x512xf32, #tpu.memory_space<vmem>>, vector<8x4xf32>
    %c8 = arith.constant 8 : index
    %c0_11 = arith.constant 0 : index
    %34 = vector.load %arg1[%c8, %c0_11] : memref<139x512xf32, #tpu.memory_space<vmem>>, vector<8x4xf32>
    %cst = arith.constant dense<0.000000e+00> : vector<8x512xf32>
    %35 = tpu.matmul %33, %0, %cst {dimension_numbers = #tpu.dot_dimension_numbers<[1], [0], [0], [1], [0, 0, 1, 1], [], []>} : vector<8x4xf32>, vector<4x512xf32>, vector<8x512xf32> -> vector<8x512xf32>
    %cst_12 = arith.constant dense<0.000000e+00> : vector<8x512xf32>
    %36 = tpu.matmul %34, %32, %cst_12 {dimension_numbers = #tpu.dot_dimension_numbers<[1], [0], [0], [1], [0, 0, 1, 1], [], []>} : vector<8x4xf32>, vector<4x512xf32>, vector<8x512xf32> -> vector<8x512xf32>
    %37 = arith.addf %35, %36 : vector<8x512xf32>
    %c16 = arith.constant 16 : index
    %c0_13 = arith.constant 0 : index
    %38 = vector.load %arg1[%c16, %c0_13] : memref<139x512xf32, #tpu.memory_space<vmem>>, vector<8x1xf32>
    %39 = vector.broadcast %38 : vector<8x1xf32> to vector<8x512xf32>
    %40 = arith.addf %37, %39 : vector<8x512xf32>
    %c24 = arith.constant 24 : index
    %c0_14 = arith.constant 0 : index
    %41 = vector.load %arg1[%c24, %c0_14] : memref<139x512xf32, #tpu.memory_space<vmem>>, vector<8x1xf32>
    %c32 = arith.constant 32 : index
    %c0_15 = arith.constant 0 : index
    %42 = vector.load %arg1[%c32, %c0_15] : memref<139x512xf32, #tpu.memory_space<vmem>>, vector<8x1xf32>
    %cst_16 = arith.constant dense<0.000000e+00> : vector<8xf32>
    %43 = vector.multi_reduction <add>, %40, %cst_16 [1] : vector<8x512xf32> to vector<8xf32>
    %44 = vector.shape_cast %43 : vector<8xf32> to vector<8x1xf32>
    %45 = arith.mulf %40, %40 : vector<8x512xf32>
    %cst_17 = arith.constant dense<0.000000e+00> : vector<8xf32>
    %46 = vector.multi_reduction <add>, %45, %cst_17 [1] : vector<8x512xf32> to vector<8xf32>
    %47 = vector.shape_cast %46 : vector<8xf32> to vector<8x1xf32>
    %cst_18 = arith.constant 0.001953125 : f32
    %48 = vector.broadcast %cst_18 : f32 to vector<8x1xf32>
    %49 = arith.mulf %44, %48 : vector<8x1xf32>
    %cst_19 = arith.constant 0.001953125 : f32
    %50 = vector.broadcast %cst_19 : f32 to vector<8x1xf32>
    %51 = arith.mulf %47, %50 : vector<8x1xf32>
    %52 = arith.mulf %49, %49 : vector<8x1xf32>
    %53 = arith.subf %51, %52 : vector<8x1xf32>
    %cst_20 = arith.constant 0.000000e+00 : f32
    %54 = vector.broadcast %cst_20 : f32 to vector<8x1xf32>
    %55 = arith.maximumf %53, %54 : vector<8x1xf32>
    %cst_21 = arith.constant 9.99999974E-6 : f32
    %56 = vector.broadcast %cst_21 : f32 to vector<8x1xf32>
    %57 = arith.addf %55, %56 : vector<8x1xf32>
    %58 = math.rsqrt %57 : vector<8x1xf32>
    %59 = arith.mulf %41, %58 : vector<8x1xf32>
    %60 = arith.mulf %49, %59 : vector<8x1xf32>
    %61 = arith.subf %42, %60 : vector<8x1xf32>
    %62 = vector.broadcast %59 : vector<8x1xf32> to vector<8x512xf32>
    %63 = arith.mulf %40, %62 : vector<8x512xf32>
    %64 = vector.broadcast %61 : vector<8x1xf32> to vector<8x512xf32>
    %65 = arith.addf %63, %64 : vector<8x512xf32>
    %cst_22 = arith.constant 0.000000e+00 : f32
    %66 = vector.broadcast %cst_22 : f32 to vector<8x512xf32>
    %67 = arith.maximumf %65, %66 : vector<8x512xf32>
    %68 = vector.extract_strided_slice %67 {offsets = [0, 0], sizes = [2, 512], strides = [1, 1]} : vector<8x512xf32> to vector<2x512xf32>
    %c34_i32 = arith.constant 34 : i32
    %69 = tpu.dynamic_rotate %68 by %c34_i32 dim 1 : vector<2x512xf32>, i32 -> vector<2x512xf32>
    %c79 = arith.constant 79 : index
    %c0_23 = arith.constant 0 : index
    %70 = vector.load %arg1[%c79, %c0_23] : memref<139x512xf32, #tpu.memory_space<vmem>>, vector<2x512xf32>
    %71 = arith.mulf %69, %70 : vector<2x512xf32>
    %c33_i32 = arith.constant 33 : i32
    %72 = tpu.dynamic_rotate %68 by %c33_i32 dim 1 : vector<2x512xf32>, i32 -> vector<2x512xf32>
    %c81 = arith.constant 81 : index
    %c0_24 = arith.constant 0 : index
    %73 = vector.load %arg1[%c81, %c0_24] : memref<139x512xf32, #tpu.memory_space<vmem>>, vector<2x512xf32>
    %74 = arith.mulf %72, %73 : vector<2x512xf32>
    %75 = arith.addf %71, %74 : vector<2x512xf32>
    %c32_i32 = arith.constant 32 : i32
    %76 = tpu.dynamic_rotate %68 by %c32_i32 dim 1 : vector<2x512xf32>, i32 -> vector<2x512xf32>
    %c83 = arith.constant 83 : index
    %c0_25 = arith.constant 0 : index
    %77 = vector.load %arg1[%c83, %c0_25] : memref<139x512xf32, #tpu.memory_space<vmem>>, vector<2x512xf32>
    %78 = arith.mulf %76, %77 : vector<2x512xf32>
    %79 = arith.addf %75, %78 : vector<2x512xf32>
    %c31_i32 = arith.constant 31 : i32
    %80 = tpu.dynamic_rotate %68 by %c31_i32 dim 1 : vector<2x512xf32>, i32 -> vector<2x512xf32>
    %c85 = arith.constant 85 : index
    %c0_26 = arith.constant 0 : index
    %81 = vector.load %arg1[%c85, %c0_26] : memref<139x512xf32, #tpu.memory_space<vmem>>, vector<2x512xf32>
    %82 = arith.mulf %80, %81 : vector<2x512xf32>
    %83 = arith.addf %79, %82 : vector<2x512xf32>
    %c30_i32 = arith.constant 30 : i32
    %84 = tpu.dynamic_rotate %68 by %c30_i32 dim 1 : vector<2x512xf32>, i32 -> vector<2x512xf32>
    %c87 = arith.constant 87 : index
    %c0_27 = arith.constant 0 : index
    %85 = vector.load %arg1[%c87, %c0_27] : memref<139x512xf32, #tpu.memory_space<vmem>>, vector<2x512xf32>
    %86 = arith.mulf %84, %85 : vector<2x512xf32>
    %87 = arith.addf %83, %86 : vector<2x512xf32>
    %c18_i32 = arith.constant 18 : i32
    %88 = tpu.dynamic_rotate %68 by %c18_i32 dim 1 : vector<2x512xf32>, i32 -> vector<2x512xf32>
    %c89 = arith.constant 89 : index
    %c0_28 = arith.constant 0 : index
    %89 = vector.load %arg1[%c89, %c0_28] : memref<139x512xf32, #tpu.memory_space<vmem>>, vector<2x512xf32>
    %90 = arith.mulf %88, %89 : vector<2x512xf32>
    %91 = arith.addf %87, %90 : vector<2x512xf32>
    %c17_i32_29 = arith.constant 17 : i32
    %92 = tpu.dynamic_rotate %68 by %c17_i32_29 dim 1 : vector<2x512xf32>, i32 -> vector<2x512xf32>
    %c91 = arith.constant 91 : index
    %c0_30 = arith.constant 0 : index
    %93 = vector.load %arg1[%c91, %c0_30] : memref<139x512xf32, #tpu.memory_space<vmem>>, vector<2x512xf32>
    %94 = arith.mulf %92, %93 : vector<2x512xf32>
    %95 = arith.addf %91, %94 : vector<2x512xf32>
    %c16_i32_31 = arith.constant 16 : i32
    %96 = tpu.dynamic_rotate %68 by %c16_i32_31 dim 1 : vector<2x512xf32>, i32 -> vector<2x512xf32>
    %c93 = arith.constant 93 : index
    %c0_32 = arith.constant 0 : index
    %97 = vector.load %arg1[%c93, %c0_32] : memref<139x512xf32, #tpu.memory_space<vmem>>, vector<2x512xf32>
    %98 = arith.mulf %96, %97 : vector<2x512xf32>
    %99 = arith.addf %95, %98 : vector<2x512xf32>
    %c15_i32_33 = arith.constant 15 : i32
    %100 = tpu.dynamic_rotate %68 by %c15_i32_33 dim 1 : vector<2x512xf32>, i32 -> vector<2x512xf32>
    %c95 = arith.constant 95 : index
    %c0_34 = arith.constant 0 : index
    %101 = vector.load %arg1[%c95, %c0_34] : memref<139x512xf32, #tpu.memory_space<vmem>>, vector<2x512xf32>
    %102 = arith.mulf %100, %101 : vector<2x512xf32>
    %103 = arith.addf %99, %102 : vector<2x512xf32>
    %c14_i32 = arith.constant 14 : i32
    %104 = tpu.dynamic_rotate %68 by %c14_i32 dim 1 : vector<2x512xf32>, i32 -> vector<2x512xf32>
    %c97 = arith.constant 97 : index
    %c0_35 = arith.constant 0 : index
    %105 = vector.load %arg1[%c97, %c0_35] : memref<139x512xf32, #tpu.memory_space<vmem>>, vector<2x512xf32>
    %106 = arith.mulf %104, %105 : vector<2x512xf32>
    %107 = arith.addf %103, %106 : vector<2x512xf32>
    %c2_i32 = arith.constant 2 : i32
    %108 = tpu.dynamic_rotate %68 by %c2_i32 dim 1 : vector<2x512xf32>, i32 -> vector<2x512xf32>
    %c99 = arith.constant 99 : index
    %c0_36 = arith.constant 0 : index
    %109 = vector.load %arg1[%c99, %c0_36] : memref<139x512xf32, #tpu.memory_space<vmem>>, vector<2x512xf32>
    %110 = arith.mulf %108, %109 : vector<2x512xf32>
    %111 = arith.addf %107, %110 : vector<2x512xf32>
    %c1_i32_37 = arith.constant 1 : i32
    %112 = tpu.dynamic_rotate %68 by %c1_i32_37 dim 1 : vector<2x512xf32>, i32 -> vector<2x512xf32>
    %c101 = arith.constant 101 : index
    %c0_38 = arith.constant 0 : index
    %113 = vector.load %arg1[%c101, %c0_38] : memref<139x512xf32, #tpu.memory_space<vmem>>, vector<2x512xf32>
    %114 = arith.mulf %112, %113 : vector<2x512xf32>
    %115 = arith.addf %111, %114 : vector<2x512xf32>
    %c103 = arith.constant 103 : index
    %c0_39 = arith.constant 0 : index
    %116 = vector.load %arg1[%c103, %c0_39] : memref<139x512xf32, #tpu.memory_space<vmem>>, vector<2x512xf32>
    %117 = arith.mulf %68, %116 : vector<2x512xf32>
    %118 = arith.addf %115, %117 : vector<2x512xf32>
    %c511_i32_40 = arith.constant 511 : i32
    %119 = tpu.dynamic_rotate %68 by %c511_i32_40 dim 1 : vector<2x512xf32>, i32 -> vector<2x512xf32>
    %c105 = arith.constant 105 : index
    %c0_41 = arith.constant 0 : index
    %120 = vector.load %arg1[%c105, %c0_41] : memref<139x512xf32, #tpu.memory_space<vmem>>, vector<2x512xf32>
    %121 = arith.mulf %119, %120 : vector<2x512xf32>
    %122 = arith.addf %118, %121 : vector<2x512xf32>
    %c510_i32 = arith.constant 510 : i32
    %123 = tpu.dynamic_rotate %68 by %c510_i32 dim 1 : vector<2x512xf32>, i32 -> vector<2x512xf32>
    %c107 = arith.constant 107 : index
    %c0_42 = arith.constant 0 : index
    %124 = vector.load %arg1[%c107, %c0_42] : memref<139x512xf32, #tpu.memory_space<vmem>>, vector<2x512xf32>
    %125 = arith.mulf %123, %124 : vector<2x512xf32>
    %126 = arith.addf %122, %125 : vector<2x512xf32>
    %c498_i32 = arith.constant 498 : i32
    %127 = tpu.dynamic_rotate %68 by %c498_i32 dim 1 : vector<2x512xf32>, i32 -> vector<2x512xf32>
    %c109 = arith.constant 109 : index
    %c0_43 = arith.constant 0 : index
    %128 = vector.load %arg1[%c109, %c0_43] : memref<139x512xf32, #tpu.memory_space<vmem>>, vector<2x512xf32>
    %129 = arith.mulf %127, %128 : vector<2x512xf32>
    %130 = arith.addf %126, %129 : vector<2x512xf32>
    %c497_i32_44 = arith.constant 497 : i32
    %131 = tpu.dynamic_rotate %68 by %c497_i32_44 dim 1 : vector<2x512xf32>, i32 -> vector<2x512xf32>
    %c111 = arith.constant 111 : index
    %c0_45 = arith.constant 0 : index
    %132 = vector.load %arg1[%c111, %c0_45] : memref<139x512xf32, #tpu.memory_space<vmem>>, vector<2x512xf32>
    %133 = arith.mulf %131, %132 : vector<2x512xf32>
    %134 = arith.addf %130, %133 : vector<2x512xf32>
    %c496_i32_46 = arith.constant 496 : i32
    %135 = tpu.dynamic_rotate %68 by %c496_i32_46 dim 1 : vector<2x512xf32>, i32 -> vector<2x512xf32>
    %c113 = arith.constant 113 : index
    %c0_47 = arith.constant 0 : index
    %136 = vector.load %arg1[%c113, %c0_47] : memref<139x512xf32, #tpu.memory_space<vmem>>, vector<2x512xf32>
    %137 = arith.mulf %135, %136 : vector<2x512xf32>
    %138 = arith.addf %134, %137 : vector<2x512xf32>
    %c495_i32_48 = arith.constant 495 : i32
    %139 = tpu.dynamic_rotate %68 by %c495_i32_48 dim 1 : vector<2x512xf32>, i32 -> vector<2x512xf32>
    %c115 = arith.constant 115 : index
    %c0_49 = arith.constant 0 : index
    %140 = vector.load %arg1[%c115, %c0_49] : memref<139x512xf32, #tpu.memory_space<vmem>>, vector<2x512xf32>
    %141 = arith.mulf %139, %140 : vector<2x512xf32>
    %142 = arith.addf %138, %141 : vector<2x512xf32>
    %c494_i32 = arith.constant 494 : i32
    %143 = tpu.dynamic_rotate %68 by %c494_i32 dim 1 : vector<2x512xf32>, i32 -> vector<2x512xf32>
    %c117 = arith.constant 117 : index
    %c0_50 = arith.constant 0 : index
    %144 = vector.load %arg1[%c117, %c0_50] : memref<139x512xf32, #tpu.memory_space<vmem>>, vector<2x512xf32>
    %145 = arith.mulf %143, %144 : vector<2x512xf32>
    %146 = arith.addf %142, %145 : vector<2x512xf32>
    %c482_i32 = arith.constant 482 : i32
    %147 = tpu.dynamic_rotate %68 by %c482_i32 dim 1 : vector<2x512xf32>, i32 -> vector<2x512xf32>
    %c119 = arith.constant 119 : index
    %c0_51 = arith.constant 0 : index
    %148 = vector.load %arg1[%c119, %c0_51] : memref<139x512xf32, #tpu.memory_space<vmem>>, vector<2x512xf32>
    %149 = arith.mulf %147, %148 : vector<2x512xf32>
    %150 = arith.addf %146, %149 : vector<2x512xf32>
    %c481_i32 = arith.constant 481 : i32
    %151 = tpu.dynamic_rotate %68 by %c481_i32 dim 1 : vector<2x512xf32>, i32 -> vector<2x512xf32>
    %c121 = arith.constant 121 : index
    %c0_52 = arith.constant 0 : index
    %152 = vector.load %arg1[%c121, %c0_52] : memref<139x512xf32, #tpu.memory_space<vmem>>, vector<2x512xf32>
    %153 = arith.mulf %151, %152 : vector<2x512xf32>
    %154 = arith.addf %150, %153 : vector<2x512xf32>
    %c480_i32 = arith.constant 480 : i32
    %155 = tpu.dynamic_rotate %68 by %c480_i32 dim 1 : vector<2x512xf32>, i32 -> vector<2x512xf32>
    %c123 = arith.constant 123 : index
    %c0_53 = arith.constant 0 : index
    %156 = vector.load %arg1[%c123, %c0_53] : memref<139x512xf32, #tpu.memory_space<vmem>>, vector<2x512xf32>
    %157 = arith.mulf %155, %156 : vector<2x512xf32>
    %158 = arith.addf %154, %157 : vector<2x512xf32>
    %c479_i32 = arith.constant 479 : i32
    %159 = tpu.dynamic_rotate %68 by %c479_i32 dim 1 : vector<2x512xf32>, i32 -> vector<2x512xf32>
    %c125 = arith.constant 125 : index
    %c0_54 = arith.constant 0 : index
    %160 = vector.load %arg1[%c125, %c0_54] : memref<139x512xf32, #tpu.memory_space<vmem>>, vector<2x512xf32>
    %161 = arith.mulf %159, %160 : vector<2x512xf32>
    %162 = arith.addf %158, %161 : vector<2x512xf32>
    %c478_i32 = arith.constant 478 : i32
    %163 = tpu.dynamic_rotate %68 by %c478_i32 dim 1 : vector<2x512xf32>, i32 -> vector<2x512xf32>
    %c127 = arith.constant 127 : index
    %c0_55 = arith.constant 0 : index
    %164 = vector.load %arg1[%c127, %c0_55] : memref<139x512xf32, #tpu.memory_space<vmem>>, vector<2x512xf32>
    %165 = arith.mulf %163, %164 : vector<2x512xf32>
    %166 = arith.addf %162, %165 : vector<2x512xf32>
    %c40 = arith.constant 40 : index
    %c0_56 = arith.constant 0 : index
    %167 = vector.load %arg1[%c40, %c0_56] : memref<139x512xf32, #tpu.memory_space<vmem>>, vector<2x1xf32>
    %168 = vector.broadcast %167 : vector<2x1xf32> to vector<2x512xf32>
    %169 = arith.addf %166, %168 : vector<2x512xf32>
    %c42 = arith.constant 42 : index
    %c0_57 = arith.constant 0 : index
    %170 = vector.load %arg1[%c42, %c0_57] : memref<139x512xf32, #tpu.memory_space<vmem>>, vector<2x1xf32>
    %c44 = arith.constant 44 : index
    %c0_58 = arith.constant 0 : index
    %171 = vector.load %arg1[%c44, %c0_58] : memref<139x512xf32, #tpu.memory_space<vmem>>, vector<2x1xf32>
    %cst_59 = arith.constant dense<0.000000e+00> : vector<2xf32>
    %172 = vector.multi_reduction <add>, %169, %cst_59 [1] : vector<2x512xf32> to vector<2xf32>
    %173 = vector.shape_cast %172 : vector<2xf32> to vector<2x1xf32>
    %174 = arith.mulf %169, %169 : vector<2x512xf32>
    %cst_60 = arith.constant dense<0.000000e+00> : vector<2xf32>
    %175 = vector.multi_reduction <add>, %174, %cst_60 [1] : vector<2x512xf32> to vector<2xf32>
    %176 = vector.shape_cast %175 : vector<2xf32> to vector<2x1xf32>
    %cst_61 = arith.constant 0.001953125 : f32
    %177 = vector.broadcast %cst_61 : f32 to vector<2x1xf32>
    %178 = arith.mulf %173, %177 : vector<2x1xf32>
    %cst_62 = arith.constant 0.001953125 : f32
    %179 = vector.broadcast %cst_62 : f32 to vector<2x1xf32>
    %180 = arith.mulf %176, %179 : vector<2x1xf32>
    %181 = arith.mulf %178, %178 : vector<2x1xf32>
    %182 = arith.subf %180, %181 : vector<2x1xf32>
    %cst_63 = arith.constant 0.000000e+00 : f32
    %183 = vector.broadcast %cst_63 : f32 to vector<2x1xf32>
    %184 = arith.maximumf %182, %183 : vector<2x1xf32>
    %cst_64 = arith.constant 9.99999974E-6 : f32
    %185 = vector.broadcast %cst_64 : f32 to vector<2x1xf32>
    %186 = arith.addf %184, %185 : vector<2x1xf32>
    %187 = math.rsqrt %186 : vector<2x1xf32>
    %188 = arith.mulf %170, %187 : vector<2x1xf32>
    %189 = arith.mulf %178, %188 : vector<2x1xf32>
    %190 = arith.subf %171, %189 : vector<2x1xf32>
    %191 = vector.broadcast %188 : vector<2x1xf32> to vector<2x512xf32>
    %192 = arith.mulf %169, %191 : vector<2x512xf32>
    %193 = vector.broadcast %190 : vector<2x1xf32> to vector<2x512xf32>
    %194 = arith.addf %192, %193 : vector<2x512xf32>
    %cst_65 = arith.constant 0.000000e+00 : f32
    %195 = vector.broadcast %cst_65 : f32 to vector<2x512xf32>
    %196 = arith.maximumf %194, %195 : vector<2x512xf32>
    %c129 = arith.constant 129 : index
    %c0_66 = arith.constant 0 : index
    %197 = vector.load %arg1[%c129, %c0_66] : memref<139x512xf32, #tpu.memory_space<vmem>>, vector<8x512xf32>
    %198 = arith.mulf %67, %197 : vector<8x512xf32>
    %c137 = arith.constant 137 : index
    %c0_67 = arith.constant 0 : index
    %199 = vector.load %arg1[%c137, %c0_67] : memref<139x512xf32, #tpu.memory_space<vmem>>, vector<2x512xf32>
    %200 = arith.mulf %196, %199 : vector<2x512xf32>
    %201 = vector.extract_strided_slice %198 {offsets = [0, 0], sizes = [8, 256], strides = [1, 1]} : vector<8x512xf32> to vector<8x256xf32>
    %cst_68 = arith.constant dense<0.000000e+00> : vector<8xf32>
    %202 = vector.multi_reduction <add>, %201, %cst_68 [1] : vector<8x256xf32> to vector<8xf32>
    %203 = vector.shape_cast %202 : vector<8xf32> to vector<8x1xf32>
    %cst_69 = arith.constant dense<0.000000e+00> : vector<1xf32>
    %204 = vector.multi_reduction <add>, %203, %cst_69 [0] : vector<8x1xf32> to vector<1xf32>
    %205 = vector.shape_cast %204 : vector<1xf32> to vector<1x1xf32>
    %206 = vector.extract_strided_slice %200 {offsets = [0, 0], sizes = [2, 256], strides = [1, 1]} : vector<2x512xf32> to vector<2x256xf32>
    %cst_70 = arith.constant dense<0.000000e+00> : vector<2xf32>
    %207 = vector.multi_reduction <add>, %206, %cst_70 [1] : vector<2x256xf32> to vector<2xf32>
    %208 = vector.shape_cast %207 : vector<2xf32> to vector<2x1xf32>
    %cst_71 = arith.constant dense<0.000000e+00> : vector<1xf32>
    %209 = vector.multi_reduction <add>, %208, %cst_71 [0] : vector<2x1xf32> to vector<1xf32>
    %210 = vector.shape_cast %209 : vector<1xf32> to vector<1x1xf32>
    %211 = arith.addf %205, %210 : vector<1x1xf32>
    %212 = vector.extract_strided_slice %198 {offsets = [0, 256], sizes = [8, 256], strides = [1, 1]} : vector<8x512xf32> to vector<8x256xf32>
    %cst_72 = arith.constant dense<0.000000e+00> : vector<8xf32>
    %213 = vector.multi_reduction <add>, %212, %cst_72 [1] : vector<8x256xf32> to vector<8xf32>
    %214 = vector.shape_cast %213 : vector<8xf32> to vector<8x1xf32>
    %cst_73 = arith.constant dense<0.000000e+00> : vector<1xf32>
    %215 = vector.multi_reduction <add>, %214, %cst_73 [0] : vector<8x1xf32> to vector<1xf32>
    %216 = vector.shape_cast %215 : vector<1xf32> to vector<1x1xf32>
    %217 = vector.extract_strided_slice %200 {offsets = [0, 256], sizes = [2, 256], strides = [1, 1]} : vector<2x512xf32> to vector<2x256xf32>
    %cst_74 = arith.constant dense<0.000000e+00> : vector<2xf32>
    %218 = vector.multi_reduction <add>, %217, %cst_74 [1] : vector<2x256xf32> to vector<2xf32>
    %219 = vector.shape_cast %218 : vector<2xf32> to vector<2x1xf32>
    %cst_75 = arith.constant dense<0.000000e+00> : vector<1xf32>
    %220 = vector.multi_reduction <add>, %219, %cst_75 [0] : vector<2x1xf32> to vector<1xf32>
    %221 = vector.shape_cast %220 : vector<1xf32> to vector<1x1xf32>
    %222 = arith.addf %216, %221 : vector<1x1xf32>
    %223 = tpu.concatenate %211, %222 in 0 : vector<1x1xf32>, vector<1x1xf32> -> vector<2x1xf32>
    %c46 = arith.constant 46 : index
    %c0_76 = arith.constant 0 : index
    %224 = vector.load %arg1[%c46, %c0_76] : memref<139x512xf32, #tpu.memory_space<vmem>>, vector<1x1xf32>
    %225 = vector.broadcast %224 : vector<1x1xf32> to vector<2x1xf32>
    %226 = arith.addf %223, %225 : vector<2x1xf32>
    %227 = math.absf %226 : vector<2x1xf32>
    %cst_77 = arith.constant 0.000000e+00 : f32
    %228 = vector.broadcast %cst_77 : f32 to vector<2x1xf32>
    %229 = arith.subf %228, %227 : vector<2x1xf32>
    %230 = math.exp %229 : vector<2x1xf32>
    %cst_78 = arith.constant 1.000000e+00 : f32
    %231 = vector.broadcast %cst_78 : f32 to vector<2x1xf32>
    %232 = arith.addf %231, %230 : vector<2x1xf32>
    %cst_79 = arith.constant 1.000000e+00 : f32
    %233 = vector.broadcast %cst_79 : f32 to vector<2x1xf32>
    %234 = arith.divf %233, %232 : vector<2x1xf32>
    %cst_80 = arith.constant 0.000000e+00 : f32
    %235 = vector.broadcast %cst_80 : f32 to vector<2x1xf32>
    %236 = arith.cmpf oge, %226, %235 : vector<2x1xf32>
    %cst_81 = arith.constant 1.000000e+00 : f32
    %237 = vector.broadcast %cst_81 : f32 to vector<2x1xf32>
    %238 = arith.subf %237, %234 : vector<2x1xf32>
    %239 = arith.select %236, %234, %238 : vector<2x1xi1>, vector<2x1xf32>
    %c0_82 = arith.constant 0 : index
    %c0_83 = arith.constant 0 : index
    %240 = vector.load %arg2[%c0_82, %c0_83] : memref<2x1xf32, #tpu.memory_space<vmem>>, vector<2x1xf32>
    tpu.vector_store %arg2[%c0_82, %c0_83], %239 {strides = array<i32>} : memref<2x1xf32, #tpu.memory_space<vmem>>, vector<2x1xf32>,
    return
  }
}

</mosaic_0001>

<bundles_post_ra>
// kernel: tpu_custom_call.1
= control target key start
LH: loop header
LB: loop body
LE: loop exit
PB: predicated region body
PF: predicated region fallthrough
CT: control target
= control target key end

     0   :  { %7 = vsyncpa [#allocation3], 0  ;;  %s3390_s0 = inlined_call_operand.hbm [shape: f32[4,512], index: 0, kind: input, shape index: {}]   ;;  %s3391_s1 = inlined_call_operand.hbm [shape: f32[139,512], index: 1, kind: input, shape index: {}]   ;;  %s3392_s2 = inlined_call_operand.vmem [shape: f32[2,1], index: 2, kind: output, shape index: {}]  }
   0x1   :  { %8 = vsyncpa [#allocation5], 0  ;;  %s2136_s9 = smov [#allocation2]   ;;  %s2137_s11 = smov [#allocation4]  }
   0x2   :  { %s15_s10 = sshll.u32 %s2136_s9, 4  ;;  %s24_s12 = sshll.u32 %s2137_s11, 4  ;;  %s16_s10 = int_to_ptr.vmem [resolvable:$true] %s15_s10  ;;  %s25_s12 = int_to_ptr.vmem [resolvable:$true] %s24_s12 }
   0x3   :  { %s2100_s13 = scalar_lea.vmem %s16_s10, 256  ;;  %p2105_p1 = scmp.lt.s32.totalorder %s16_s10, %s16_s10 }
   0x4   :  { %p2101_p0 = scmp.ne.s32.totalorder %s16_s10, %s2100_s13  ;;  %p2106_p2 = scmp.lt.s32.totalorder %s2100_s13, %s2100_s13 }
   0x6   :  { %p2107_p3 = por %p2106_p2, %p2105_p1 }
   0x8   :  { %p2108_p4 = pnand %p2107_p3, %p2101_p0 }
   0xa   :  { %2111 = shalt.err (!%p2108_p4)
}
   0xb   :  { %18 = dma.hbm_to_vmem [thread:$0]  %s3390_s0, 256, %s16_s10, [#allocation3]  }
   0xc   :  { %s2120_s16 = scalar_lea.vmem %s25_s12, 9216  ;;  %p2125_p6 = scmp.lt.s32.totalorder %s25_s12, %s25_s12 }
   0xd   :  { %p2121_p5 = scmp.ne.s32.totalorder %s25_s12, %s2120_s16  ;;  %p2126_p7 = scmp.lt.s32.totalorder %s2120_s16, %s2120_s16 }
   0xf   :  { %p2127_p8 = por %p2126_p7, %p2125_p6 }
  0x11   :  { %p2128_p9 = pnand %p2127_p8, %p2121_p5 }
  0x13   :  { %2131 = shalt.err (!%p2128_p9)
}
  0x14   :  { %s2138_s17 = smov 512   ;;  %s2139_s18 = smov 32  }
  0x15   :  { %30 = dma.hbm_to_vmem [thread:$0]  %s3391_s1, 9216, %s25_s12, [#allocation5], %s2138_s17, %s2138_s17, %s2139_s18  }
  0x16   :  { %2132 = dma.done.wait [#allocation3], 256  }
  0x17   :  { %2133 = vsyncadd [#allocation3], 4294967040 }
  0x18   :  { %2134 = dma.done.wait [#allocation5], 9216  }
  0x19   :  { %2135 = vsyncadd [#allocation5], 4294958080  ;;  %v2187_v0 = vld [vmem:[#allocation2] sm:$0xff]  ;;  %v2189_v1 = vld [vmem:[#allocation2 + $0x8] sm:$0xff]  ;;  %s2140_s0 = smov 16   ;;  %s2141_s21 = smov 17   ;;  %v53_v13 = vlaneseq }
  0x1a   :  { %107 = vrot.lane.b32.xlu1 %v2187_v0, %s2140_s0  ;;  %45 = vrot.lane.b32.xlu0 %v2187_v0, %s2141_s21  ;;  %v2197_v2 = vcombine.high %v2189_v1, %v2189_v1  ;;  %v2201_v3 = vcombine.high %v2187_v0, %v2187_v0  ;;  %s2142_s1 = smov 15   ;;  %s2143_s22 = smov 1   ;;  %v3393_v4 = vmov 0.0   ;;  %v770_v5 = vld [vmem:[#allocation4 + $0x40] sm:$0xff]  ;;  %v2149_v6 = vmov 0  }
  0x1b   :  { %s2144_s23 = smov 127   ;;  %s2145_s24 = smov 113   ;;  %539 = vmatprep.mubr.f32.mxu0 %v3393_v4  ;;  %610 = vmatprep.mubr.f32.mxu1 %v3393_v4  ;;  %v2281_v16 = vld [vmem:[#allocation4 + $0xa0] sm:$0x80]  ;;  %v2283_v17 = vld [vmem:[#allocation4 + $0xc0] sm:$0x7] }
  0x1c   :  { %s2146_s25 = smov 112   ;;  %s2147_s26 = smov 111   ;;  %2080 = vset.pattern.permute.xlu0 %v2149_v6  ;;  %2081 = vset.pattern.permute.xlu1 %v2149_v6  ;;  %v2285_v18 = vand.u32 127, %v53_v13  ;;  %v2287_v19 = vld [vmem:[#allocation4 + $0xa8] sm:$0x80]  ;;  %v77_v20 = vrot.slane %v2281_v16, 7 }
  0x1d   :  { %v78_v21 = vrot.slane %v2283_v17, 7  ;;  %v2291_v22 = vld [vmem:[#allocation4 + $0xc8] sm:$0x7]  ;;  %v2293_v23 = vld [vmem:[#allocation4 + $0xc0] sm:$0x78]  ;;  %vm76_vm0 = vcmask 1040384  }
  0x1e   :  { %51 = vrot.lane.b32.xlu1 %v2197_v2, %s2141_s21  ;;  %47 = vrot.lane.b32.xlu0 %v2201_v3, %s2141_s21  ;;  %v2299_v26 = vld [vmem:[#allocation4 + $0xc8] sm:$0x78]  ;;  %v62_v27 = vld [vmem:[#allocation4 + $0xb0] sm:$0x80]  ;;  %v63_v28 = vld [vmem:[#allocation4 + $0xb8] sm:$0x80] }
  0x1f   :  { %v66_v29 = vld [vmem:[#allocation4 + $0xd0] sm:$0x7]  ;;  %v67_v30 = vld [vmem:[#allocation4 + $0xd8] sm:$0x7]  ;;  %v163_v31 = vld [vmem:[#allocation4 + $0xc0] sm:$0x80] }
  0x20   :  { %v167_v32 = vld [vmem:[#allocation4 + $0xe0] sm:$0x7]  ;;  %v164_v33 = vld [vmem:[#allocation4 + $0xc8] sm:$0x80]  ;;  %v168_v34 = vld [vmem:[#allocation4 + $0xe8] sm:$0x7] }
  0x21   :  { %v80_v35 = vrot.slane %v2287_v19, 7  ;;  %v81_v36 = vrot.slane %v2291_v22, 7  ;;  %v128_v37 = vrot.slane %v2293_v23, 3  ;;  %v129_v38 = vrot.slane %v2299_v26, 3  ;;  %v2310_v49 = vld [vmem:[#allocation4 + $0xd0] sm:$0x78] }
  0x22   :  { %113 = vrot.lane.b32.xlu1 %v2197_v2, %s2140_s0  ;;  %109 = vrot.lane.b32.xlu0 %v2201_v3, %s2140_s0  ;;  %vm55_vm1 = vcmp.lt.s32.totalorder %v2285_v18, 17  ;;  %v83_v41 = vrot.slane %v62_v27, 7  ;;  %v84_v42 = vrot.slane %v66_v29, 7  ;;  %v86_v43 = vrot.slane %v63_v28, 7  ;;  %v2312_v50 = vld [vmem:[#allocation4 + $0xd8] sm:$0x78] }
  0x23   :  { %v87_v44 = vrot.slane %v67_v30, 7  ;;  %v179_v45 = vrot.slane %v163_v31, 7  ;;  %v180_v46 = vrot.slane %v167_v32, 7  ;;  %v182_v47 = vrot.slane %v164_v33, 7  ;;  %v2314_v51 = vld [vmem:[#allocation4 + $0xe0] sm:$0x78] }
  0x24   :  { %v183_v48 = vrot.slane %v168_v34, 7  ;;  %v165_v52 = vld [vmem:[#allocation4 + $0xd0] sm:$0x80]  ;;  %vm115_vm2 = vcmp.lt.s32.totalorder %v2285_v18, 16  ;;  %v166_v55 = vld [vmem:[#allocation4 + $0xd8] sm:$0x80] }
  0x25   :  { %v169_v56 = vld [vmem:[#allocation4 + $0xf0] sm:$0x7]  ;;  %v170_v57 = vld [vmem:[#allocation4 + $0xf8] sm:$0x7]  ;;  %v2321_v58 = vld [vmem:[#allocation4 + $0xe8] sm:$0x78] }
  0x26   :  { %150 = vrot.lane.b32.xlu1 %v2187_v0, %s2142_s1  ;;  %49 = vrot.lane.b32.xlu0 %v2189_v1, %s2141_s21  ;;  %v265_v59 = vld [vmem:[#allocation4 + $0xe0] sm:$0x80]  ;;  %v269_v60 = vld [vmem:[#allocation4 + $0x100] sm:$0x7]  ;;  %vm158_vm3 = vcmp.lt.s32.totalorder %v2285_v18, 15  ;;  %v185_v6 = vrot.slane %v165_v52, 7  ;;  %v79_v52 = vsel %vm76_vm0, %v77_v20, %v78_v21  ;;  %v184_v17 = vsel %vm76_vm0, %v182_v47, %v183_v48 }
  0x27   :  { %v266_v63 = vld [vmem:[#allocation4 + $0xe8] sm:$0x80]  ;;  %v186_v13 = vrot.slane %v169_v56, 7  ;;  %v188_v19 = vrot.slane %v166_v55, 7  ;;  %v189_v22 = vrot.slane %v170_v57, 7  ;;  %v281_v31 = vrot.slane %v265_v59, 7 }
  0x28   :  { %v282_v32 = vrot.slane %v269_v60, 7  ;;  %v284_v33 = vrot.slane %v266_v63, 7  ;;  %v267_v4 = vld [vmem:[#allocation4 + $0xf0] sm:$0x80]  ;;  %v271_v62 = vld [vmem:[#allocation4 + $0x110] sm:$0x7]  ;;  %v82_v55 = vsel %vm76_vm0, %v80_v35, %v81_v36  ;;  %v85_v56 = vsel %vm76_vm0, %v83_v41, %v84_v42 }
  0x29   :  { %v88_v57 = vsel %vm76_vm0, %v86_v43, %v87_v44  ;;  %vm217_vm4 = vcmp.lt.s32.totalorder %v2285_v18, 1  ;;  %v2341_v59 = vld [vmem:[#allocation4 + $0xf0] sm:$0x78]  ;;  %v2343_v60 = vld [vmem:[#allocation4 + $0xf8] sm:$0x78]  ;;  %v2348_v16 = vsel %vm76_vm0, %v185_v6, %v186_v13  ;;  %v2351_v20 = vsel %vm76_vm0, %v188_v19, %v189_v22  ;;  %s2150_s27 = smov 34  }
  0x2a   :  { %156 = vrot.lane.b32.xlu1 %v2197_v2, %s2142_s1  ;;  %152 = vrot.lane.b32.xlu0 %v2201_v3, %s2142_s1  ;;  %v268_v63 = vld [vmem:[#allocation4 + $0xf8] sm:$0x80]  ;;  %v272_v21 = vld [vmem:[#allocation4 + $0x118] sm:$0x7]  ;;  %v367_v35 = vld [vmem:[#allocation4 + $0x100] sm:$0x80]  ;;  %v2365_v47 = vsel %vm76_vm0, %v281_v31, %v282_v32 }
  0x2b   :  { %v371_v36 = vld [vmem:[#allocation4 + $0x120] sm:$0x7]  ;;  %vm260_vm5 = vcmp.lt.s32.totalorder %v2285_v18, 127  ;;  %v232_v6 = vrot.slane %v2341_v59, 3  ;;  %v2372_v19 = vld [vmem:[#allocation4 + $0x100] sm:$0x78] }
  0x2c   :  { %v290_v22 = vrot.slane %v268_v63, 7  ;;  %v291_v28 = vrot.slane %v272_v21, 7  ;;  %v383_v27 = vrot.slane %v367_v35, 7  ;;  %v384_v61 = vrot.slane %v371_v36, 7  ;;  %s2151_s28 = smov 33   ;;  %s2152_s29 = smov 31  }
  0x2d   :  { %vm319_vm6 = vcmp.lt.s32.totalorder %v2285_v18, 113  ;;  %vm362_vm7 = vcmp.lt.s32.totalorder %v2285_v18, 112  ;;  %vm421_vm8 = vcmp.lt.s32.totalorder %v2285_v18, 111  ;;  %vm466_vm9 = vcmask 1043456   ;;  %s2153_s30 = smov 30   ;;  %s2154_s3 = smov 18  }
  0x2e   :  { %209 = vrot.lane.b32.xlu1 %v2187_v0, %s2143_s22  ;;  %111 = vrot.lane.b32.xlu0 %v2189_v1, %s2140_s0  ;;  %vm462_vm10 = vcmask 31744   ;;  %s2155_s4 = smov 14   ;;  %s2156_s5 = smov 2   ;;  %vm836_vm11 = vcmp.lt.s32.totalorder %v2285_v18, 34  ;;  %vm885_vm12 = vcmp.lt.s32.totalorder %v2285_v18, 33  ;;  %vm922_vm13 = vcmp.lt.s32.totalorder %v2285_v18, 32 }
  0x2f   :  { %s2157_s6 = smov 126   ;;  %s2158_s7 = smov 114   ;;  %vm959_vm14 = vcmp.lt.s32.totalorder %v2285_v18, 31  ;;  %vm996_vm15 = vcmp.lt.s32.totalorder %v2285_v18, 30 }
  0x30   :  { %s2159_s8 = smov 110   ;;  %s2160_s9 = smov 98  }
  0x31   :  { %s2161_s10 = smov 97   ;;  %s2162_s11 = smov 96  }
  0x32   :  { %215 = vrot.lane.b32.xlu1 %v2197_v2, %s2143_s22  ;;  %211 = vrot.lane.b32.xlu0 %v2201_v3, %s2143_s22  ;;  %s2163_s12 = smov 95   ;;  %s2164_s13 = smov 94  }
  0x36   :  { %252 = vrot.lane.b32.xlu1 %v2187_v0, %s2144_s23  ;;  %154 = vrot.lane.b32.xlu0 %v2189_v1, %s2142_s1 }
  0x3a   :  { %256 = vrot.lane.b32.xlu1 %v2189_v1, %s2144_s23  ;;  %254 = vrot.lane.b32.xlu0 %v2201_v3, %s2144_s23 }
  0x3e   :  { %311 = vrot.lane.b32.xlu1 %v2187_v0, %s2145_s24  ;;  %213 = vrot.lane.b32.xlu0 %v2189_v1, %s2143_s22 }
  0x42   :  { %315 = vrot.lane.b32.xlu1 %v2189_v1, %s2145_s24  ;;  %313 = vrot.lane.b32.xlu0 %v2201_v3, %s2145_s24 }
  0x46   :  { %354 = vrot.lane.b32.xlu1 %v2187_v0, %s2146_s25  ;;  %258 = vrot.lane.b32.xlu0 %v2197_v2, %s2144_s23 }
  0x4a   :  { %358 = vrot.lane.b32.xlu1 %v2189_v1, %s2146_s25  ;;  %356 = vrot.lane.b32.xlu0 %v2201_v3, %s2146_s25 }
  0x4e   :  { %413 = vrot.lane.b32.xlu1 %v2187_v0, %s2147_s26  ;;  %317 = vrot.lane.b32.xlu0 %v2197_v2, %s2145_s24 }
  0x52   :  { %417 = vrot.lane.b32.xlu1 %v2189_v1, %s2147_s26  ;;  %415 = vrot.lane.b32.xlu0 %v2201_v3, %s2147_s26 }
  0x56   :  { %419 = vrot.lane.b32.xlu1 %v2197_v2, %s2147_s26  ;;  %360 = vrot.lane.b32.xlu0 %v2197_v2, %s2146_s25 }
  0x5a   :  { %773 = vperm.xlu0 %2080, %v770_v5   ;;  %v270_v5 = vld [vmem:[#allocation4 + $0x108] sm:$0x7] }
  0x5b   :  { %v285_v34 = vrot.slane %v270_v5, 7  ;;  %v181_v5 = vsel %vm76_vm0, %v179_v45, %v180_v46  ;;  %v287_v45 = vrot.slane %v267_v4, 7  ;;  %v288_v46 = vrot.slane %v271_v62, 7 }
  0x5d   :  { %v2368_v48 = vsel %vm76_vm0, %v284_v33, %v285_v34  ;;  %v368_v33 = vld [vmem:[#allocation4 + $0x108] sm:$0x80]  ;;  %v372_v34 = vld [vmem:[#allocation4 + $0x128] sm:$0x7]  ;;  %v2390_v21 = vsel %vm76_vm0, %v287_v45, %v288_v46 }
  0x5e   :  { %v386_v45 = vrot.slane %v368_v33, 7  ;;  %v387_v46 = vrot.slane %v372_v34, 7  ;;  %v3425_v34 = vrot.slane %v2312_v50, 3 }
  0x8c   :  { %v2265_v7 = vpop.permute.xlu1 %107  ;;  %v2267_v8 = vpop.permute.xlu0 %45 }
  0x90   :  { %v2269_v9 = vpop.permute.xlu1 %51  ;;  %v2271_v10 = vpop.permute.xlu0 %47 }
  0x91   :  { %v59_v41 = vsel %vm55_vm1, %v2269_v9, %v2267_v8  ;;  %v58_v42 = vsel %vm55_vm1, %v2267_v8, %v2271_v10  ;;  %v2374_v8 = vld [vmem:[#allocation4 + $0x108] sm:$0x78] }
  0x92   :  { %v93_v4 = vadd.f32 %v79_v52, %v59_v41  ;;  %v94_v62 = vadd.f32 %v82_v55, %v58_v42  ;;  %v2419_v52 = vld [vmem:[#allocation4 + $0x110] sm:$0x78] }
  0x94   :  { %v2273_v11 = vpop.permute.xlu1 %113  ;;  %v2275_v12 = vpop.permute.xlu0 %109  ;;  %v101_v55 = vcombine.low %v93_v4, %v94_v62  ;;  %v3424_v62 = vrot.slane %v2310_v49, 3 }
  0x95   :  { %v119_v31 = vsel %vm115_vm2, %v2273_v11, %v2265_v7  ;;  %v118_v32 = vsel %vm115_vm2, %v2265_v7, %v2275_v12 }
  0x96   :  { %v136_v42 = vadd.f32 %v128_v37, %v119_v31 }
  0x98   :  { %v2277_v14 = vpop.permute.xlu1 %150  ;;  %v2279_v15 = vpop.permute.xlu0 %49 }
  0x99   :  { %v56_v35 = vsel %vm55_vm1, %v2279_v15, %v2269_v9  ;;  %v57_v7 = vsel %vm55_vm1, %v2271_v10, %v2279_v15  ;;  %v137_v9 = vadd.f32 %v129_v38, %v118_v32  ;;  %v2413_v10 = vsel %vm76_vm0, %v290_v22, %v291_v28  ;;  %v2444_v22 = vld [vmem:[#allocation4 + $0x120] sm:$0x78] }
  0x9a   :  { %v2417_v15 = vsel %vm76_vm0, %v383_v27, %v384_v61  ;;  %v95_v23 = vadd.f32 %v85_v56, %v57_v7  ;;  %v96_v37 = vadd.f32 %v88_v57, %v56_v35  ;;  %v434_v49 = vrot.slane %v2444_v22, 3 }
  0x9b   :  { %v144_v57 = vcombine.low %v136_v42, %v137_v9  ;;  %v105_v42 = vmax.f32 %v2187_v0, %v101_v55 }
  0x9c   :  { %v2295_v24 = vpop.permute.xlu1 %156  ;;  %v2297_v25 = vpop.permute.xlu0 %152  ;;  %v102_v9 = vcombine.low %v95_v23, %v96_v37 }
  0x9d   :  { %v162_v36 = vsel %vm158_vm3, %v2295_v24, %v2277_v14  ;;  %v161_v41 = vsel %vm158_vm3, %v2277_v14, %v2297_v25  ;;  %v2421_v14 = vld [vmem:[#allocation4 + $0x118] sm:$0x78] }
  0x9e   :  { %v195_v31 = vadd.f32 %v181_v5, %v162_v36  ;;  %v196_v26 = vadd.f32 %v184_v17, %v161_v41  ;;  %v388_v5 = vsel %vm76_vm0, %v386_v45, %v387_v46  ;;  %v335_v17 = vrot.slane %v2421_v14, 3 }
  0x9f   :  { %v3427_v36 = vrot.slane %v2321_v58, 3 }
  0xa0   :  { %v2305_v39 = vpop.permute.xlu1 %209  ;;  %v2307_v40 = vpop.permute.xlu0 %111  ;;  %v203_v45 = vcombine.low %v195_v31, %v196_v26 }
  0xa1   :  { %v116_v28 = vsel %vm115_vm2, %v2307_v40, %v2273_v11  ;;  %v117_v61 = vsel %vm115_vm2, %v2275_v12, %v2307_v40  ;;  %v334_v11 = vrot.slane %v2419_v52, 3 }
  0xa2   :  { %v138_v33 = vadd.f32 %v3424_v62, %v117_v61  ;;  %v139_v35 = vadd.f32 %v3425_v34, %v116_v28  ;;  %v373_v34 = vld [vmem:[#allocation4 + $0x130] sm:$0x7] }
  0xa4   :  { %v2317_v53 = vpop.permute.xlu1 %215  ;;  %v2319_v54 = vpop.permute.xlu0 %211 }
  0xa5   :  { %v221_v27 = vsel %vm217_vm4, %v2317_v53, %v2305_v39  ;;  %v220_v56 = vsel %vm217_vm4, %v2305_v39, %v2319_v54 }
  0xa8   :  { %v2328_v29 = vpop.permute.xlu1 %252  ;;  %v2330_v30 = vpop.permute.xlu0 %154 }
  0xa9   :  { %v159_v12 = vsel %vm158_vm3, %v2330_v30, %v2295_v24  ;;  %v160_v40 = vsel %vm158_vm3, %v2297_v25, %v2330_v30  ;;  %v3426_v24 = vrot.slane %v2314_v51, 3  ;;  %v239_v25 = vadd.f32 %v3427_v36, %v220_v56  ;;  %v374_v36 = vld [vmem:[#allocation4 + $0x138] sm:$0x7] }
  0xaa   :  { %v197_v50 = vadd.f32 %v2348_v16, %v160_v40  ;;  %v198_v46 = vadd.f32 %v2351_v20, %v159_v12  ;;  %v3430_v12 = vrot.slane %v2374_v8, 3  ;;  %v106_v40 = vmax.f32 %v2189_v1, %v102_v9 }
  0xab   :  { %v238_v7 = vadd.f32 %v3426_v24, %v221_v27  ;;  %v3428_v27 = vrot.slane %v2343_v60, 3 }
  0xac   :  { %v2361_v43 = vpop.permute.xlu1 %256  ;;  %v255_v44 = vpop.permute.xlu0 %254 }
  0xad   :  { %v262_v39 = vsel %vm260_vm5, %v255_v44, %v2361_v43  ;;  %v263_v4 = vsel %vm260_vm5, %v2328_v29, %v255_v44  ;;  %v2471_v44 = vld [vmem:[#allocation4 + $0x128] sm:$0x78]  ;;  %v246_v37 = vcombine.low %v238_v7, %v239_v25  ;;  %v370_v7 = vld [vmem:[#allocation4 + $0x118] sm:$0x80] }
  0xae   :  { %v297_v51 = vadd.f32 %v2365_v47, %v263_v4  ;;  %v298_v58 = vadd.f32 %v2368_v48, %v262_v39  ;;  %v148_v47 = vmax.f32 %v105_v42, %v144_v57  ;;  %v145_v48 = vcombine.low %v138_v33, %v139_v35  ;;  %v369_v33 = vld [vmem:[#allocation4 + $0x110] sm:$0x80] }
  0xaf   :  { %v204_v4 = vcombine.low %v197_v50, %v198_v46  ;;  %v392_v46 = vrot.slane %v370_v7, 7 }
  0xb0   :  { %v2384_v13 = vpop.permute.xlu1 %311  ;;  %v214_v63 = vpop.permute.xlu0 %213  ;;  %v207_v39 = vmax.f32 %v148_v47, %v203_v45  ;;  %v305_v62 = vcombine.low %v297_v51, %v298_v58  ;;  %v149_v8 = vmax.f32 %v106_v40, %v145_v48  ;;  %v429_v45 = vld [vmem:[#allocation4 + $0x138] sm:$0x78]  ;;  %v393_v51 = vrot.slane %v374_v36, 7 }
  0xb1   :  { %v218_v55 = vsel %vm217_vm4, %v214_v63, %v2317_v53  ;;  %v219_v23 = vsel %vm217_vm4, %v2319_v54, %v214_v63  ;;  %v435_v53 = vrot.slane %v2471_v44, 3 }
  0xb2   :  { %v240_v61 = vadd.f32 %v232_v6, %v219_v23  ;;  %v241_v56 = vadd.f32 %v3428_v27, %v218_v55  ;;  %v250_v25 = vmax.f32 %v207_v39, %v246_v37  ;;  %v208_v44 = vmax.f32 %v149_v8, %v204_v4 }
  0xb3   :  { %v437_v37 = vrot.slane %v429_v45, 3  ;;  %v394_v14 = vsel %vm76_vm0, %v392_v46, %v393_v51 }
  0xb4   :  { %v2423_v38 = vpop.permute.xlu1 %315  ;;  %v314_v32 = vpop.permute.xlu0 %313  ;;  %v309_v50 = vmax.f32 %v250_v25, %v305_v62 }
  0xb5   :  { %v321_v16 = vsel %vm319_vm6, %v314_v32, %v2423_v38  ;;  %v322_v20 = vsel %vm319_vm6, %v2384_v13, %v314_v32 }
  0xb8   :  { %v2468_v30 = vpop.permute.xlu1 %354  ;;  %v259_v41 = vpop.permute.xlu0 %258 }
  0xb9   :  { %v261_v54 = vsel %vm260_vm5, %v2361_v43, %v259_v41  ;;  %v264_v63 = vsel %vm260_vm5, %v259_v41, %v2328_v29  ;;  %v3429_v43 = vrot.slane %v2372_v19, 3  ;;  %v341_v29 = vadd.f32 %v3430_v12, %v321_v16 }
  0xba   :  { %v299_v35 = vadd.f32 %v2390_v21, %v261_v54  ;;  %v300_v59 = vadd.f32 %v2413_v10, %v264_v63  ;;  %v247_v21 = vcombine.low %v240_v61, %v241_v56  ;;  %v428_v10 = vld [vmem:[#allocation4 + $0x130] sm:$0x78] }
  0xbb   :  { %v340_v57 = vadd.f32 %v3429_v43, %v322_v20  ;;  %v436_v48 = vrot.slane %v428_v10, 3 }
  0xbc   :  { %v2491_v31 = vpop.permute.xlu1 %358  ;;  %v357_v26 = vpop.permute.xlu0 %356  ;;  %v306_v58 = vcombine.low %v299_v35, %v300_v59 }
  0xbd   :  { %v364_v32 = vsel %vm362_vm7, %v357_v26, %v2491_v31  ;;  %v365_v28 = vsel %vm362_vm7, %v2468_v30, %v357_v26  ;;  %v348_v9 = vcombine.low %v340_v57, %v341_v29  ;;  %v251_v26 = vmax.f32 %v208_v44, %v247_v21 }
  0xbe   :  { %v399_v60 = vadd.f32 %v2417_v15, %v365_v28  ;;  %v400_v6 = vadd.f32 %v388_v5, %v364_v32  ;;  %v389_v15 = vrot.slane %v369_v33, 7  ;;  %v390_v5 = vrot.slane %v373_v34, 7  ;;  %v457_v34 = vld [vmem:[#allocation4 + $0x20] sm:$0xff] }
  0xbf   :  { %v352_v52 = vmax.f32 %v309_v50, %v348_v9 }
  0xc0   :  { %v414_v24 = vpop.permute.xlu1 %413  ;;  %v318_v19 = vpop.permute.xlu0 %317  ;;  %v407_v55 = vcombine.low %v399_v60, %v400_v6  ;;  %v456_v6 = vld [vmem:[#allocation4] sm:$0xff] }
  0xc1   :  { %v320_v41 = vsel %vm319_vm6, %v2423_v38, %v318_v19  ;;  %v323_v42 = vsel %vm319_vm6, %v318_v19, %v2384_v13 }
  0xc2   :  { %v342_v23 = vadd.f32 %v334_v11, %v320_v41  ;;  %v343_v38 = vadd.f32 %v335_v17, %v323_v42  ;;  %v391_v11 = vsel %vm76_vm0, %v389_v15, %v390_v5  ;;  %v310_v17 = vmax.f32 %v251_v26, %v306_v58 }
  0xc3   :  { %v411_v27 = vmax.f32 %v352_v52, %v407_v55  ;;  %v780_v52 = vld [vmem:[#allocation4 + $0x60] sm:$0xff] }
  0xc4   :  { %v418_v16 = vpop.permute.xlu1 %417  ;;  %v416_v13 = vpop.permute.xlu0 %415  ;;  %v349_v32 = vcombine.low %v342_v23, %v343_v38 }
  0xc5   :  { %v423_v20 = vsel %vm421_vm8, %v416_v13, %v418_v16  ;;  %v424_v47 = vsel %vm421_vm8, %v414_v24, %v416_v13 }
  0xc6   :  { %v442_v54 = vadd.f32 %v434_v49, %v424_v47  ;;  %v443_v63 = vadd.f32 %v435_v53, %v423_v20  ;;  %v353_v62 = vmax.f32 %v310_v17, %v349_v32  ;;  %v781_v17 = vld [vmem:[#allocation4 + $0x80] sm:$0xff] }
  0xc8   :  { %v420_v28 = vpop.permute.xlu1 %419  ;;  %v361_v61 = vpop.permute.xlu0 %360  ;;  %v450_v56 = vcombine.low %v442_v54, %v443_v63 }
  0xc9   :  { %v422_v43 = vsel %vm421_vm8, %v418_v16, %v420_v28  ;;  %v425_v57 = vsel %vm421_vm8, %v420_v28, %v414_v24  ;;  %v363_v22 = vsel %vm362_vm7, %v2491_v31, %v361_v61  ;;  %v366_v49 = vsel %vm362_vm7, %v361_v61, %v2468_v30 }
  0xca   :  { %v444_v53 = vadd.f32 %v436_v48, %v422_v43  ;;  %v445_v12 = vadd.f32 %v437_v37, %v425_v57  ;;  %v401_v29 = vadd.f32 %v391_v11, %v363_v22  ;;  %v402_v40 = vadd.f32 %v394_v14, %v366_v49 }
  0xcb   :  { %v454_v39 = vmax.f32 %v411_v27, %v450_v56  ;;  %v3431_v30 = vmov 0.0  }
  0xcc   :  { %v408_v4 = vcombine.low %v401_v29, %v402_v40  ;;  %v451_v59 = vcombine.low %v444_v53, %v445_v12 }
  0xcd   :  { %v460_v33 = vcombine.high %v454_v39, %v454_v39 }
  0xce   :  { %v412_v35 = vmax.f32 %v353_v62, %v408_v4 }
  0xcf   :  { %2039 = vmatprep.subr.msk.mxu0 %vm466_vm9, %v460_v33 }
  0xd0   :  { %2040 = vmatpush1.msk.msra.mxu0 %vm466_vm9, %v454_v39  ;;  %v455_v31 = vmax.f32 %v412_v35, %v451_v59 }
  0xd1   :  { %2041 = vmatmul.mubr.msk.f32.vlgmr.msra.gmra.mxu0 %vm462_vm10, %v457_v34  ;;  %2045 = vmatprep.subr.msk.mxu0 %vm466_vm9, %v2201_v3 }
  0xd2   :  { %2046 = vmatpush1.msk.msra.mxu0 %vm466_vm9, %v2187_v0  ;;  %692 = vmatprep.mubr.f32.mxu0 %v3431_v30  ;;  %v461_v60 = vcombine.high %v455_v31, %v455_v31 }
  0xd4   :  { %2042 = vmatprep.subr.msk.mxu1 %vm466_vm9, %v461_v60  ;;  %v842_v60 = vld [vmem:[#allocation4 + $0x128] sm:$0x80] }
  0xd5   :  { %2047 = vmatmul.mubr.msk.f32.vlgmr.msra.gmra.mxu0 %vm462_vm10, %v456_v6  ;;  %2043 = vmatpush1.msk.msra.mxu1 %vm466_vm9, %v455_v31  ;;  %v774_v36 = vpop.permute.xlu0 %773  ;;  %v841_v31 = vld [vmem:[#allocation4 + $0x120] sm:$0x80] }
  0xd6   :  { %2044 = vmatmul.mubr.msk.f32.vlgmr.msra.gmra.mxu1 %vm462_vm10, %v457_v34  ;;  %2048 = vmatprep.subr.msk.mxu1 %vm466_vm9, %v2197_v2 }
  0xd7   :  { %2049 = vmatpush1.msk.msra.mxu1 %vm466_vm9, %v2189_v1  ;;  %763 = vmatprep.mubr.f32.mxu1 %v3431_v30  ;;  %v845_v30 = vld [vmem:[#allocation4 + $0x140] sm:$0x1]  ;;  %vm1049_vm9 = vcmp.lt.s32.totalorder %v2285_v18, 18 }
  0xda   :  { %2050 = vmatmul.mubr.msk.f32.vlgmr.msra.gmra.mxu1 %vm462_vm10, %v456_v6  ;;  %v846_v6 = vld [vmem:[#allocation4 + $0x148] sm:$0x1]  ;;  %vm1631_vm10 = vcmp.lt.s32.totalorder %v2285_v18, 98 }
 0x191   :  { %v541_v0 = vpop.f32.mrf.mxu0 }
 0x193   :  { %v543_v3 = vpop.f32.mrf.mxu0 }
 0x195   :  { %v694_v24 = vpop.f32.mrf.mxu0 }
 0x196   :  { %v695_v19 = vadd.f32 %v694_v24, %v541_v0  ;;  %v612_v7 = vpop.f32.mrf.mxu1  ;;  %v843_v24 = vld [vmem:[#allocation4 + $0x130] sm:$0x80] }
 0x197   :  { %v696_v8 = vpop.f32.mrf.mxu0 }
 0x198   :  { %v697_v25 = vadd.f32 %v696_v8, %v543_v3  ;;  %v614_v41 = vpop.f32.mrf.mxu1  ;;  %v776_v42 = vadd.f32 %v774_v36, %v695_v19  ;;  %v844_v19 = vld [vmem:[#allocation4 + $0x138] sm:$0x80]  ;;  %v858_v8 = vrot.slane %v845_v30, 7 }
 0x19a   :  { %v777_v21 = vadd.f32 %v774_v36, %v697_v25  ;;  %v765_v9 = vpop.f32.mrf.mxu1  ;;  %v787_v44 = vmul.f32 %v776_v42, %v776_v42  ;;  %v860_v25 = vrot.slane %v842_v60, 7 }
 0x19b   :  { %v766_v2 = vadd.f32 %v765_v9, %v612_v7  ;;  %v847_v7 = vld [vmem:[#allocation4 + $0x150] sm:$0x1]  ;;  %v863_v9 = vrot.slane %v843_v24, 7 }
 0x19c   :  { %v767_v10 = vpop.f32.mrf.mxu1  ;;  %v788_v45 = vmul.f32 %v777_v21, %v777_v21  ;;  %v782_v5 = vadd.f32 %v777_v21, %v776_v42 }
 0x19d   :  { %v778_v1 = vadd.f32 %v774_v36, %v766_v2  ;;  %v768_v15 = vadd.f32 %v767_v10, %v614_v41  ;;  %v861_v41 = vrot.slane %v846_v6, 7  ;;  %v864_v2 = vrot.slane %v847_v7, 7  ;;  %v965_v7 = vld [vmem:[#allocation4 + $0x148] sm:$0x60] }
 0x19e   :  { %v791_v58 = vadd.f32 %v788_v45, %v787_v44  ;;  %v866_v10 = vrot.slane %v844_v19, 7  ;;  %v893_v44 = vld [vmem:[#allocation4 + $0x158] sm:$0x6] }
 0x19f   :  { %v779_v50 = vadd.f32 %v774_v36, %v768_v15  ;;  %v783_v46 = vadd.f32 %v782_v5, %v778_v1  ;;  %v789_v51 = vmul.f32 %v778_v1, %v778_v1  ;;  %v857_v36 = vrot.slane %v841_v31, 7  ;;  %v927_v15 = vld [vmem:[#allocation4 + $0x140] sm:$0x18]  ;;  %v892_v5 = vld [vmem:[#allocation4 + $0x150] sm:$0x6] }
 0x1a1   :  { %v784_v55 = vadd.f32 %v783_v46, %v779_v50  ;;  %v790_v23 = vmul.f32 %v779_v50, %v779_v50  ;;  %v792_v38 = vadd.f32 %v791_v58, %v789_v51  ;;  %v859_v51 = vsel %vm76_vm0, %v857_v36, %v858_v8 }
 0x1a2   :  { %v862_v58 = vsel %vm76_vm0, %v860_v25, %v861_v41 }
 0x1a3   :  { %785 = vadd.xlane.f32.xlu1 %v784_v55  ;;  %v793_v16 = vadd.f32 %v792_v38, %v790_v23  ;;  %v891_v55 = vld [vmem:[#allocation4 + $0x148] sm:$0x6]  ;;  %v928_v38 = vld [vmem:[#allocation4 + $0x148] sm:$0x18] }
 0x1a5   :  { %794 = vadd.xlane.f32.xlu0 %v793_v16 }
 0x22c   :  { %v786_v13 = vpop.xlane.xlu1 %785 }
 0x22d   :  { %v796_v20 = vmul.f32 0.001953125, %v786_v13  ;;  %v935_v13 = vrot.slane %v927_v15, 3 }
 0x22e   :  { %v795_v47 = vpop.xlane.xlu0 %794 }
 0x22f   :  { %v798_v48 = vmul.f32 %v796_v20, %v796_v20  ;;  %v797_v37 = vmul.f32 0.001953125, %v795_v47  ;;  %v900_v47 = vrot.slane %v892_v5, 1 }
 0x231   :  { %v799_v26 = vsub.f32 %v797_v37, %v798_v48  ;;  %v901_v48 = vrot.slane %v893_v44, 1  ;;  %v973_v44 = vrot.slane %v965_v7, 5 }
 0x233   :  { %v800_v54 = vmax.f32 %v799_v26, 0.0  ;;  %v865_v26 = vsel %vm76_vm0, %v863_v9, %v864_v2 }
 0x235   :  { %v801_v63 = vadd.f32 1e-05, %v800_v54 }
 0x237   :  { %2084 = vrsqrt.f32 %v801_v63 }
 0x244   :  { %v2085_v11 = vpop.eup %2084 }
 0x245   :  { %v803_v14 = vmul.f32 %v2085_v11, %v780_v52 }
 0x247   :  { %808 = vperm.xlu1 %2081, %v803_v14   ;;  %v804_v32 = vmul.f32 %v803_v14, %v796_v20  ;;  %v899_v14 = vrot.slane %v891_v55, 1  ;;  %v966_v55 = vld [vmem:[#allocation4 + $0x150] sm:$0x60] }
 0x249   :  { %v805_v28 = vsub.f32 %v781_v17, %v804_v32  ;;  %v936_v32 = vrot.slane %v928_v38, 3 }
 0x24b   :  { %817 = vperm.xlu0 %2080, %v805_v28   ;;  %v964_v28 = vld [vmem:[#allocation4 + $0x140] sm:$0x60] }
 0x24c   :  { %v972_v60 = vrot.slane %v964_v28, 5 }
 0x2c2   :  { %v809_v61 = vpop.permute.xlu1 %808 }
 0x2c3   :  { %v811_v27 = vmul.f32 %v809_v61, %v776_v42  ;;  %v814_v56 = vmul.f32 %v809_v61, %v779_v50  ;;  %v812_v57 = vmul.f32 %v809_v61, %v777_v21  ;;  %v813_v40 = vmul.f32 %v809_v61, %v778_v1  ;;  %v848_v42 = vld [vmem:[#allocation4 + $0x158] sm:$0x1]  ;;  %v890_v21 = vld [vmem:[#allocation4 + $0x140] sm:$0x6]  ;;  %v929_v61 = vld [vmem:[#allocation4 + $0x150] sm:$0x18] }
 0x2c4   :  { %v867_v50 = vrot.slane %v848_v42, 7  ;;  %v898_v46 = vrot.slane %v890_v21, 1  ;;  %v937_v6 = vrot.slane %v929_v61, 3  ;;  %v1001_v42 = vld [vmem:[#allocation4 + $0x140] sm:$0x80] }
 0x2c5   :  { %v1005_v21 = vld [vmem:[#allocation4 + $0x160] sm:$0x1] }
 0x2c6   :  { %v818_v43 = vpop.permute.xlu0 %817  ;;  %v868_v11 = vsel %vm76_vm0, %v866_v10, %v867_v50  ;;  %v1002_v50 = vld [vmem:[#allocation4 + $0x148] sm:$0x80] }
 0x2c7   :  { %v820_v22 = vadd.f32 %v818_v43, %v811_v27  ;;  %v823_v49 = vadd.f32 %v818_v43, %v814_v56  ;;  %v821_v53 = vadd.f32 %v818_v43, %v812_v57  ;;  %v822_v39 = vadd.f32 %v818_v43, %v813_v40  ;;  %v930_v57 = vld [vmem:[#allocation4 + $0x158] sm:$0x18] }
 0x2c9   :  { %v2564_v12 = vmax.f32 %v820_v22, 0.0  ;;  %v2566_v29 = vmax.f32 %v823_v49, 0.0  ;;  %v2570_v4 = vmax.f32 %v821_v53, 0.0  ;;  %v2574_v62 = vmax.f32 %v822_v39, 0.0 }
 0x2cb   :  { %3432 = vst [vmem:[#allocation8_spill] sm:$0xff] %v2564_v12  ;;  %3433 = vst [vmem:[#allocation9_spill] sm:$0xff] %v2566_v29  ;;  %834 = vrot.lane.b32.xlu0 %v2566_v29, %s2150_s27  ;;  %828 = vrot.lane.b32.xlu1 %v2564_v12, %s2150_s27 }
 0x2cc   :  { %3434 = vst [vmem:[#allocation10_spill] sm:$0xff] %v2570_v4  ;;  %3435 = vst [vmem:[#allocation11_spill] sm:$0xff] %v2574_v62 }
 0x2cf   :  { %879 = vrot.lane.b32.xlu0 %v2570_v4, %s2151_s28  ;;  %830 = vrot.lane.b32.xlu1 %v2570_v4, %s2150_s27 }
 0x2d3   :  { %832 = vrot.lane.b32.xlu0 %v2574_v62, %s2150_s27  ;;  %877 = vrot.lane.b32.xlu1 %v2564_v12, %s2151_s28 }
 0x2d7   :  { %914 = vrot.lane.b32.xlu0 %v2564_v12, %s2139_s18  ;;  %883 = vrot.lane.b32.xlu1 %v2566_v29, %s2151_s28 }
 0x2db   :  { %920 = vrot.lane.b32.xlu0 %v2566_v29, %s2139_s18  ;;  %881 = vrot.lane.b32.xlu1 %v2574_v62, %s2151_s28 }
 0x2df   :  { %951 = vrot.lane.b32.xlu0 %v2564_v12, %s2152_s29  ;;  %916 = vrot.lane.b32.xlu1 %v2570_v4, %s2139_s18 }
 0x2e3   :  { %957 = vrot.lane.b32.xlu0 %v2566_v29, %s2152_s29  ;;  %918 = vrot.lane.b32.xlu1 %v2574_v62, %s2139_s18 }
 0x2e7   :  { %988 = vrot.lane.b32.xlu0 %v2564_v12, %s2153_s30  ;;  %953 = vrot.lane.b32.xlu1 %v2570_v4, %s2152_s29 }
 0x2eb   :  { %994 = vrot.lane.b32.xlu0 %v2566_v29, %s2153_s30  ;;  %955 = vrot.lane.b32.xlu1 %v2574_v62, %s2152_s29 }
 0x2ef   :  { %1041 = vrot.lane.b32.xlu0 %v2564_v12, %s2154_s3  ;;  %990 = vrot.lane.b32.xlu1 %v2570_v4, %s2153_s30 }
 0x2f3   :  { %1047 = vrot.lane.b32.xlu0 %v2566_v29, %s2154_s3  ;;  %992 = vrot.lane.b32.xlu1 %v2574_v62, %s2153_s30 }
 0x2f7   :  { %1078 = vrot.lane.b32.xlu0 %v2564_v12, %s2141_s21  ;;  %1043 = vrot.lane.b32.xlu1 %v2570_v4, %s2154_s3 }
 0x2fb   :  { %1084 = vrot.lane.b32.xlu0 %v2566_v29, %s2141_s21  ;;  %1045 = vrot.lane.b32.xlu1 %v2574_v62, %s2154_s3 }
 0x2ff   :  { %1114 = vrot.lane.b32.xlu0 %v2564_v12, %s2140_s0  ;;  %1080 = vrot.lane.b32.xlu1 %v2570_v4, %s2141_s21 }
 0x303   :  { %1120 = vrot.lane.b32.xlu0 %v2566_v29, %s2140_s0  ;;  %1082 = vrot.lane.b32.xlu1 %v2574_v62, %s2141_s21 }
 0x307   :  { %1150 = vrot.lane.b32.xlu0 %v2564_v12, %s2142_s1  ;;  %1116 = vrot.lane.b32.xlu1 %v2570_v4, %s2140_s0 }
 0x30b   :  { %1156 = vrot.lane.b32.xlu0 %v2566_v29, %s2142_s1  ;;  %1118 = vrot.lane.b32.xlu1 %v2574_v62, %s2140_s0 }
 0x30f   :  { %1202 = vrot.lane.b32.xlu0 %v2564_v12, %s2155_s4  ;;  %1152 = vrot.lane.b32.xlu1 %v2570_v4, %s2142_s1 }
 0x313   :  { %1208 = vrot.lane.b32.xlu0 %v2566_v29, %s2155_s4  ;;  %1154 = vrot.lane.b32.xlu1 %v2574_v62, %s2142_s1 }
 0x317   :  { %1239 = vrot.lane.b32.xlu0 %v2564_v12, %s2156_s5  ;;  %1204 = vrot.lane.b32.xlu1 %v2570_v4, %s2155_s4 }
 0x31b   :  { %1245 = vrot.lane.b32.xlu0 %v2566_v29, %s2156_s5  ;;  %1206 = vrot.lane.b32.xlu1 %v2574_v62, %s2155_s4 }
 0x31f   :  { %1276 = vrot.lane.b32.xlu0 %v2564_v12, %s2143_s22  ;;  %1241 = vrot.lane.b32.xlu1 %v2570_v4, %s2156_s5 }
 0x323   :  { %1282 = vrot.lane.b32.xlu0 %v2566_v29, %s2143_s22  ;;  %1243 = vrot.lane.b32.xlu1 %v2574_v62, %s2156_s5 }
 0x327   :  { %1352 = vrot.lane.b32.xlu0 %v2564_v12, %s2144_s23  ;;  %1278 = vrot.lane.b32.xlu1 %v2570_v4, %s2143_s22 }
 0x32b   :  { %1356 = vrot.lane.b32.xlu0 %v2574_v62, %s2144_s23  ;;  %1280 = vrot.lane.b32.xlu1 %v2574_v62, %s2143_s22 }
 0x32f   :  { %1388 = vrot.lane.b32.xlu0 %v2564_v12, %s2157_s6  ;;  %1354 = vrot.lane.b32.xlu1 %v2570_v4, %s2144_s23 }
 0x333   :  { %1392 = vrot.lane.b32.xlu0 %v2574_v62, %s2157_s6  ;;  %1358 = vrot.lane.b32.xlu1 %v2566_v29, %s2144_s23 }
 0x337   :  { %1425 = vrot.lane.b32.xlu0 %v2564_v12, %s2158_s7  ;;  %1390 = vrot.lane.b32.xlu1 %v2570_v4, %s2157_s6 }
 0x33b   :  { %1429 = vrot.lane.b32.xlu0 %v2574_v62, %s2158_s7  ;;  %1394 = vrot.lane.b32.xlu1 %v2566_v29, %s2157_s6 }
 0x33d   :  { %v2654_v33 = vpop.permute.xlu0 %834  ;;  %v2656_v34 = vpop.permute.xlu1 %828 }
 0x33e   :  { %v840_v16 = vsel %vm836_vm11, %v2654_v33, %v2656_v34 }
 0x33f   :  { %1462 = vrot.lane.b32.xlu0 %v2564_v12, %s2145_s24  ;;  %1427 = vrot.lane.b32.xlu1 %v2570_v4, %s2158_s7  ;;  %v873_v27 = vmul.f32 %v859_v51, %v840_v16  ;;  %v1017_v51 = vrot.slane %v1001_v42, 7  ;;  %v1055_v42 = vld [vmem:[#allocation4 + $0x168] sm:$0x6] }
 0x341   :  { %v2661_v35 = vpop.permute.xlu0 %879  ;;  %v2663_v59 = vpop.permute.xlu1 %830 }
 0x342   :  { %v839_v22 = vsel %vm836_vm11, %v2656_v34, %v2663_v59  ;;  %v938_v34 = vrot.slane %v930_v57, 3  ;;  %v1008_v57 = vld [vmem:[#allocation4 + $0x178] sm:$0x1] }
 0x343   :  { %1466 = vrot.lane.b32.xlu0 %v2574_v62, %s2145_s24  ;;  %1431 = vrot.lane.b32.xlu1 %v2566_v29, %s2158_s7 }
 0x345   :  { %v833_v0 = vpop.permute.xlu0 %832  ;;  %v878_v3 = vpop.permute.xlu1 %877 }
 0x346   :  { %v837_v56 = vsel %vm836_vm11, %v833_v0, %v2654_v33  ;;  %v838_v43 = vsel %vm836_vm11, %v2663_v59, %v833_v0  ;;  %v888_v33 = vsel %vm885_vm12, %v878_v3, %v2661_v35  ;;  %v874_v59 = vmul.f32 %v862_v58, %v839_v22 }
 0x347   :  { %1514 = vrot.lane.b32.xlu0 %v2564_v12, %s2146_s25  ;;  %1464 = vrot.lane.b32.xlu1 %v2570_v4, %s2145_s24  ;;  %v875_v0 = vmul.f32 %v865_v26, %v838_v43  ;;  %v876_v24 = vmul.f32 %v868_v11, %v837_v56  ;;  %v907_v36 = vmul.f32 %v899_v14, %v888_v33  ;;  %v1018_v58 = vrot.slane %v1005_v21, 7  ;;  %v1004_v56 = vld [vmem:[#allocation4 + $0x158] sm:$0x80]  ;;  %v1007_v43 = vld [vmem:[#allocation4 + $0x170] sm:$0x1] }
 0x348   :  { %v1020_v26 = vrot.slane %v1002_v50, 7  ;;  %v974_v11 = vrot.slane %v966_v55, 5  ;;  %v1063_v50 = vrot.slane %v1055_v42, 1  ;;  %vm1795_vm11 = vcmp.lt.s32.totalorder %v2285_v18, 94 }
 0x349   :  { %v915_v45 = vpop.permute.xlu0 %914  ;;  %v884_v1 = vpop.permute.xlu1 %883  ;;  %v911_v38 = vadd.f32 %v907_v36, %v874_v59 }
 0x34a   :  { %v889_v23 = vsel %vm885_vm12, %v884_v1, %v878_v3 }
 0x34b   :  { %1518 = vrot.lane.b32.xlu0 %v2574_v62, %s2146_s25  ;;  %1468 = vrot.lane.b32.xlu1 %v2566_v29, %s2145_s24  ;;  %v906_v17 = vmul.f32 %v898_v46, %v889_v23  ;;  %v1006_v46 = vld [vmem:[#allocation4 + $0x168] sm:$0x1]  ;;  %v967_v23 = vld [vmem:[#allocation4 + $0x158] sm:$0x60] }
 0x34c   :  { %v975_v14 = vrot.slane %v967_v23, 5 }
 0x34d   :  { %v921_v20 = vpop.permute.xlu0 %920  ;;  %v882_v37 = vpop.permute.xlu1 %881  ;;  %v910_v19 = vadd.f32 %v906_v17, %v873_v27  ;;  %v1019_v17 = vsel %vm76_vm0, %v1017_v51, %v1018_v58  ;;  %v1056_v51 = vld [vmem:[#allocation4 + $0x170] sm:$0x6]  ;;  %v1057_v58 = vld [vmem:[#allocation4 + $0x178] sm:$0x6] }
 0x34e   :  { %v926_v54 = vsel %vm922_vm13, %v921_v20, %v915_v45  ;;  %v886_v63 = vsel %vm885_vm12, %v882_v37, %v884_v1  ;;  %v887_v52 = vsel %vm885_vm12, %v2661_v35, %v882_v37  ;;  %vm1852_vm12 = vcmask 1041408  }
 0x34f   :  { %1550 = vrot.lane.b32.xlu0 %v2564_v12, %s2147_s26  ;;  %1516 = vrot.lane.b32.xlu1 %v2570_v4, %s2146_s25  ;;  %v943_v49 = vmul.f32 %v935_v13, %v926_v54  ;;  %v908_v53 = vmul.f32 %v900_v47, %v887_v52  ;;  %v909_v40 = vmul.f32 %v901_v48, %v886_v63  ;;  %v1021_v54 = vrot.slane %v1006_v46, 7  ;;  %v1090_v46 = vld [vmem:[#allocation4 + $0x160] sm:$0x18] }
 0x351   :  { %v952_v39 = vpop.permute.xlu0 %951  ;;  %v917_v31 = vpop.permute.xlu1 %916  ;;  %v947_v8 = vadd.f32 %v943_v49, %v910_v19  ;;  %v912_v35 = vadd.f32 %v908_v53, %v875_v0  ;;  %v913_v3 = vadd.f32 %v909_v40, %v876_v24  ;;  %v1022_v40 = vsel %vm76_vm0, %v1020_v26, %v1021_v54  ;;  %v1091_v54 = vld [vmem:[#allocation4 + $0x168] sm:$0x18] }
 0x352   :  { %v925_v30 = vsel %vm922_vm13, %v915_v45, %v917_v31  ;;  %v1026_v0 = vrot.slane %v1004_v56, 7  ;;  %v1027_v24 = vrot.slane %v1008_v57, 7  ;;  %v1065_v26 = vrot.slane %v1057_v58, 1  ;;  %v1092_v57 = vld [vmem:[#allocation4 + $0x170] sm:$0x18] }
 0x353   :  { %1554 = vrot.lane.b32.xlu0 %v2574_v62, %s2147_s26  ;;  %1520 = vrot.lane.b32.xlu1 %v2566_v29, %s2146_s25  ;;  %v944_v9 = vmul.f32 %v936_v32, %v925_v30  ;;  %v1003_v32 = vld [vmem:[#allocation4 + $0x150] sm:$0x80]  ;;  %v1054_v30 = vld [vmem:[#allocation4 + $0x160] sm:$0x6]  ;;  %v1099_v56 = vrot.slane %v1091_v54, 3 }
 0x354   :  { %v1165_v54 = vld [vmem:[#allocation4 + $0x178] sm:$0x80] }
 0x355   :  { %v958_v25 = vpop.permute.xlu0 %957  ;;  %v919_v41 = vpop.permute.xlu1 %918  ;;  %v948_v63 = vadd.f32 %v944_v9, %v911_v38 }
 0x356   :  { %v963_v2 = vsel %vm959_vm14, %v958_v25, %v952_v39  ;;  %v923_v10 = vsel %vm922_vm13, %v919_v41, %v921_v20  ;;  %v924_v45 = vsel %vm922_vm13, %v917_v31, %v919_v41  ;;  %v1028_v41 = vsel %vm76_vm0, %v1026_v0, %v1027_v24  ;;  %v1127_v24 = vld [vmem:[#allocation4 + $0x168] sm:$0x60] }
 0x357   :  { %v980_v1 = vmul.f32 %v972_v60, %v963_v2  ;;  %v945_v15 = vmul.f32 %v937_v6, %v924_v45  ;;  %v946_v5 = vmul.f32 %v938_v34, %v923_v10  ;;  %1586 = vrot.lane.b32.xlu0 %v2564_v12, %s2159_s8  ;;  %1552 = vrot.lane.b32.xlu1 %v2570_v4, %s2147_s26  ;;  %v1023_v60 = vrot.slane %v1003_v32, 7 }
 0x358   :  { %v1024_v6 = vrot.slane %v1007_v43, 7  ;;  %v1126_v43 = vld [vmem:[#allocation4 + $0x160] sm:$0x60]  ;;  %vm1933_vm13 = vcmask 1046528  }
 0x359   :  { %v984_v16 = vadd.f32 %v980_v1, %v947_v8  ;;  %v949_v13 = vadd.f32 %v945_v15, %v912_v35  ;;  %v950_v20 = vadd.f32 %v946_v5, %v913_v3  ;;  %v989_v47 = vpop.permute.xlu0 %988  ;;  %v954_v48 = vpop.permute.xlu1 %953  ;;  %v1062_v3 = vrot.slane %v1054_v30, 1 }
 0x35a   :  { %v962_v37 = vsel %vm959_vm14, %v952_v39, %v954_v48 }
 0x35b   :  { %v981_v52 = vmul.f32 %v973_v44, %v962_v37  ;;  %1590 = vrot.lane.b32.xlu0 %v2574_v62, %s2159_s8  ;;  %1556 = vrot.lane.b32.xlu1 %v2566_v29, %s2147_s26  ;;  %v1064_v37 = vrot.slane %v1056_v51, 1 }
 0x35d   :  { %v985_v28 = vadd.f32 %v981_v52, %v948_v63  ;;  %v995_v61 = vpop.permute.xlu0 %994  ;;  %v956_v27 = vpop.permute.xlu1 %955 }
 0x35e   :  { %v1000_v22 = vsel %vm996_vm15, %v995_v61, %v989_v47  ;;  %v960_v49 = vsel %vm959_vm14, %v956_v27, %v958_v25  ;;  %v961_v53 = vsel %vm959_vm14, %v954_v48, %v956_v27  ;;  %v1025_v25 = vsel %vm76_vm0, %v1023_v60, %v1024_v6 }
 0x35f   :  { %v1033_v39 = vmul.f32 %v1019_v17, %v1000_v22  ;;  %v982_v31 = vmul.f32 %v974_v11, %v961_v53  ;;  %v983_v33 = vmul.f32 %v975_v14, %v960_v49  ;;  %1623 = vrot.lane.b32.xlu0 %v2564_v12, %s2160_s9  ;;  %1588 = vrot.lane.b32.xlu1 %v2570_v4, %s2159_s8  ;;  %v1098_v48 = vrot.slane %v1090_v46, 3  ;;  %v1093_v22 = vld [vmem:[#allocation4 + $0x178] sm:$0x18] }
 0x360   :  { %v1134_v60 = vrot.slane %v1126_v43, 5  ;;  %v1100_v6 = vrot.slane %v1092_v57, 3  ;;  %v1101_v0 = vrot.slane %v1093_v22, 3  ;;  %v1187_v22 = vrot.slane %v1165_v54, 7 }
 0x361   :  { %v1037_v19 = vadd.f32 %v1033_v39, %v984_v16  ;;  %v986_v34 = vadd.f32 %v982_v31, %v949_v13  ;;  %v987_v59 = vadd.f32 %v983_v33, %v950_v20  ;;  %v1042_v7 = vpop.permute.xlu0 %1041  ;;  %v991_v36 = vpop.permute.xlu1 %990  ;;  %vm2031_vm14 = vcmask 1024  }
 0x362   :  { %v999_v8 = vsel %vm996_vm15, %v989_v47, %v991_v36 }
 0x363   :  { %v1034_v35 = vmul.f32 %v1022_v40, %v999_v8  ;;  %1627 = vrot.lane.b32.xlu0 %v2574_v62, %s2160_s9  ;;  %1592 = vrot.lane.b32.xlu1 %v2566_v29, %s2159_s8 }
 0x365   :  { %v1038_v21 = vadd.f32 %v1034_v35, %v985_v28  ;;  %v1048_v9 = vpop.permute.xlu0 %1047  ;;  %v993_v2 = vpop.permute.xlu1 %992 }
 0x366   :  { %v1053_v10 = vsel %vm1049_vm9, %v1048_v9, %v1042_v7  ;;  %v997_v45 = vsel %vm996_vm15, %v993_v2, %v995_v61  ;;  %v998_v1 = vsel %vm996_vm15, %v991_v36, %v993_v2  ;;  %v1166_v36 = vld [vmem:[#allocation4 + $0x180] sm:$0x1]  ;;  %v1167_v2 = vld [vmem:[#allocation4 + $0x188] sm:$0x1] }
 0x367   :  { %v1070_v15 = vmul.f32 %v1062_v3, %v1053_v10  ;;  %v1035_v5 = vmul.f32 %v1025_v25, %v998_v1  ;;  %v1036_v44 = vmul.f32 %v1028_v41, %v997_v45  ;;  %1676 = vrot.lane.b32.xlu0 %v2564_v12, %s2161_s10  ;;  %1625 = vrot.lane.b32.xlu1 %v2570_v4, %s2160_s9  ;;  %v1179_v45 = vrot.slane %v1166_v36, 7  ;;  %v1128_v1 = vld [vmem:[#allocation4 + $0x170] sm:$0x60] }
 0x369   :  { %v1074_v55 = vadd.f32 %v1070_v15, %v1037_v19  ;;  %v1039_v23 = vadd.f32 %v1035_v5, %v986_v34  ;;  %v1040_v38 = vadd.f32 %v1036_v44, %v987_v59  ;;  %v1079_v16 = vpop.permute.xlu0 %1078  ;;  %v1044_v13 = vpop.permute.xlu1 %1043  ;;  %v1129_v15 = vld [vmem:[#allocation4 + $0x178] sm:$0x60] }
 0x36a   :  { %v1052_v20 = vsel %vm1049_vm9, %v1042_v7, %v1044_v13  ;;  %v1162_v7 = vld [vmem:[#allocation4 + $0x160] sm:$0x80] }
 0x36b   :  { %v1071_v47 = vmul.f32 %v1063_v50, %v1052_v20  ;;  %1680 = vrot.lane.b32.xlu0 %v2574_v62, %s2161_s10  ;;  %1629 = vrot.lane.b32.xlu1 %v2566_v29, %s2160_s9  ;;  %v1178_v10 = vrot.slane %v1162_v7, 7 }
 0x36d   :  { %v1075_v63 = vadd.f32 %v1071_v47, %v1038_v21  ;;  %v1085_v52 = vpop.permute.xlu0 %1084  ;;  %v1046_v11 = vpop.permute.xlu1 %1045  ;;  %v1135_v21 = vrot.slane %v1127_v24, 5  ;;  %v1180_v20 = vsel %vm76_vm0, %v1178_v10, %v1179_v45  ;;  %v1164_v47 = vld [vmem:[#allocation4 + $0x170] sm:$0x80]  ;;  %v1218_v10 = vld [vmem:[#allocation4 + $0x198] sm:$0x6] }
 0x36e   :  { %v1089_v14 = vsel %vm55_vm1, %v1085_v52, %v1079_v16  ;;  %v1050_v17 = vsel %vm1049_vm9, %v1046_v11, %v1048_v9  ;;  %v1051_v32 = vsel %vm1049_vm9, %v1044_v13, %v1046_v11  ;;  %v1163_v9 = vld [vmem:[#allocation4 + $0x168] sm:$0x80]  ;;  %v1137_v13 = vrot.slane %v1129_v15, 5 }
 0x36f   :  { %v1106_v28 = vmul.f32 %v1098_v48, %v1089_v14  ;;  %v1072_v61 = vmul.f32 %v1064_v37, %v1051_v32  ;;  %v1073_v27 = vmul.f32 %v1065_v26, %v1050_v17  ;;  %1713 = vrot.lane.b32.xlu0 %v2564_v12, %s2162_s11  ;;  %1678 = vrot.lane.b32.xlu1 %v2570_v4, %s2161_s10  ;;  %v1184_v43 = vrot.slane %v1164_v47, 7 }
 0x371   :  { %v1110_v49 = vadd.f32 %v1106_v28, %v1074_v55  ;;  %v1076_v53 = vadd.f32 %v1072_v61, %v1039_v23  ;;  %v1077_v40 = vadd.f32 %v1073_v27, %v1040_v38  ;;  %v1115_v39 = vpop.permute.xlu0 %1114  ;;  %v1081_v31 = vpop.permute.xlu1 %1080  ;;  %v1181_v55 = vrot.slane %v1163_v9, 7  ;;  %v1252_v9 = vld [vmem:[#allocation4 + $0x180] sm:$0x18] }
 0x372   :  { %v1088_v33 = vsel %vm55_vm1, %v1079_v16, %v1081_v31  ;;  %v1182_v23 = vrot.slane %v1167_v2, 7  ;;  %v1136_v16 = vrot.slane %v1128_v1, 5  ;;  %v1217_v2 = vld [vmem:[#allocation4 + $0x190] sm:$0x6] }
 0x373   :  { %v1107_v30 = vmul.f32 %v1099_v56, %v1088_v33  ;;  %1717 = vrot.lane.b32.xlu0 %v2574_v62, %s2162_s11  ;;  %1682 = vrot.lane.b32.xlu1 %v2566_v29, %s2161_s10  ;;  %v1215_v56 = vld [vmem:[#allocation4 + $0x180] sm:$0x6] }
 0x374   :  { %v1183_v32 = vsel %vm76_vm0, %v1181_v55, %v1182_v23  ;;  %v1226_v55 = vrot.slane %v1218_v10, 1  ;;  %v1253_v23 = vld [vmem:[#allocation4 + $0x188] sm:$0x18] }
 0x375   :  { %v1111_v19 = vadd.f32 %v1107_v30, %v1075_v63  ;;  %v1121_v34 = vpop.permute.xlu0 %1120  ;;  %v1083_v59 = vpop.permute.xlu1 %1082  ;;  %v1168_v63 = vld [vmem:[#allocation4 + $0x190] sm:$0x1] }
 0x376   :  { %v1125_v8 = vsel %vm115_vm2, %v1121_v34, %v1115_v39  ;;  %v1086_v35 = vsel %vm55_vm1, %v1083_v59, %v1085_v52  ;;  %v1087_v3 = vsel %vm55_vm1, %v1081_v31, %v1083_v59  ;;  %v1169_v52 = vld [vmem:[#allocation4 + $0x198] sm:$0x1]  ;;  %v1185_v57 = vrot.slane %v1168_v63, 7 }
 0x377   :  { %v1142_v25 = vmul.f32 %v1134_v60, %v1125_v8  ;;  %v1108_v41 = vmul.f32 %v1100_v6, %v1087_v3  ;;  %v1109_v42 = vmul.f32 %v1101_v0, %v1086_v35  ;;  %1750 = vrot.lane.b32.xlu0 %v2564_v12, %s2163_s12  ;;  %1715 = vrot.lane.b32.xlu1 %v2570_v4, %s2162_s11  ;;  %vm1210_vm1 = vcmp.lt.s32.totalorder %v2285_v18, 14 }
 0x378   :  { %v1223_v6 = vrot.slane %v1215_v56, 1  ;;  %v1186_v0 = vsel %vm76_vm0, %v1184_v43, %v1185_v57  ;;  %v1261_v63 = vrot.slane %v1253_v23, 3 }
 0x379   :  { %v1146_v5 = vadd.f32 %v1142_v25, %v1110_v49  ;;  %v1112_v44 = vadd.f32 %v1108_v41, %v1076_v53  ;;  %v1113_v50 = vadd.f32 %v1109_v42, %v1077_v40  ;;  %v1151_v46 = vpop.permute.xlu0 %1150  ;;  %v1117_v51 = vpop.permute.xlu1 %1116  ;;  %v1188_v49 = vrot.slane %v1169_v52, 7  ;;  %v1288_v52 = vld [vmem:[#allocation4 + $0x180] sm:$0x60] }
 0x37a   :  { %v1124_v58 = vsel %vm115_vm2, %v1115_v39, %v1117_v51  ;;  %v1296_v57 = vrot.slane %v1288_v52, 5 }
 0x37b   :  { %v1143_v38 = vmul.f32 %v1135_v21, %v1124_v58  ;;  %1754 = vrot.lane.b32.xlu0 %v2574_v62, %s2163_s12  ;;  %1719 = vrot.lane.b32.xlu1 %v2566_v29, %s2162_s11  ;;  %v1189_v24 = vsel %vm76_vm0, %v1187_v22, %v1188_v49  ;;  %v1840_v21 = vld [vmem:[#allocation4 + $0xa0] sm:$0x3]  ;;  %v1225_v58 = vrot.slane %v1217_v2, 1 }
 0x37d   :  { %v1147_v48 = vadd.f32 %v1143_v38, %v1111_v19  ;;  %v1157_v37 = vpop.permute.xlu0 %1156  ;;  %v1119_v26 = vpop.permute.xlu1 %1118  ;;  %v1216_v19 = vld [vmem:[#allocation4 + $0x188] sm:$0x6] }
 0x37e   :  { %v1161_v11 = vsel %vm158_vm3, %v1157_v37, %v1151_v46  ;;  %v1122_v14 = vsel %vm115_vm2, %v1119_v26, %v1121_v34  ;;  %v1123_v17 = vsel %vm115_vm2, %v1117_v51, %v1119_v26  ;;  %v1224_v42 = vrot.slane %v1216_v19, 1 }
 0x37f   :  { %v1194_v28 = vmul.f32 %v1180_v20, %v1161_v11  ;;  %v1144_v61 = vmul.f32 %v1136_v16, %v1123_v17  ;;  %v1145_v27 = vmul.f32 %v1137_v13, %v1122_v14  ;;  %1787 = vrot.lane.b32.xlu0 %v2564_v12, %s2164_s13  ;;  %1752 = vrot.lane.b32.xlu1 %v2570_v4, %s2163_s12  ;;  %vm1247_vm2 = vcmp.lt.s32.totalorder %v2285_v18, 2  ;;  %v1254_v11 = vld [vmem:[#allocation4 + $0x190] sm:$0x18]  ;;  %v1255_v14 = vld [vmem:[#allocation4 + $0x198] sm:$0x18] }
 0x380   :  { %v1260_v51 = vrot.slane %v1252_v9, 3  ;;  %v1262_v22 = vrot.slane %v1254_v11, 3  ;;  %v1263_v49 = vrot.slane %v1255_v14, 3 }
 0x381   :  { %v1198_v53 = vadd.f32 %v1194_v28, %v1146_v5  ;;  %v1148_v40 = vadd.f32 %v1144_v61, %v1112_v44  ;;  %v1149_v39 = vadd.f32 %v1145_v27, %v1113_v50  ;;  %v1203_v31 = vpop.permute.xlu0 %1202  ;;  %v1153_v33 = vpop.permute.xlu1 %1152 }
 0x382   :  { %v1160_v30 = vsel %vm158_vm3, %v1151_v46, %v1153_v33 }
 0x383   :  { %v1195_v60 = vmul.f32 %v1183_v32, %v1160_v30  ;;  %1791 = vrot.lane.b32.xlu0 %v2574_v62, %s2164_s13  ;;  %1756 = vrot.lane.b32.xlu1 %v2566_v29, %s2163_s12 }
 0x385   :  { %v1199_v34 = vadd.f32 %v1195_v60, %v1147_v48  ;;  %v1209_v59 = vpop.permute.xlu0 %1208  ;;  %v1155_v7 = vpop.permute.xlu1 %1154 }
 0x386   :  { %v1214_v36 = vsel %vm1210_vm1, %v1209_v59, %v1203_v31  ;;  %v1158_v8 = vsel %vm158_vm3, %v1155_v7, %v1157_v37  ;;  %v1159_v35 = vsel %vm158_vm3, %v1153_v33, %v1155_v7  ;;  %vm1396_vm3 = vcmp.lt.s32.totalorder %v2285_v18, 126 }
 0x387   :  { %v1231_v3 = vmul.f32 %v1223_v6, %v1214_v36  ;;  %v1196_v25 = vmul.f32 %v1186_v0, %v1159_v35  ;;  %v1197_v41 = vmul.f32 %v1189_v24, %v1158_v8  ;;  %1793 = vrot.lane.b32.xlu0 %v2566_v29, %s2164_s13  ;;  %1789 = vrot.lane.b32.xlu1 %v2570_v4, %s2164_s13  ;;  %v1313_v0 = vld [vmem:[#allocation4 + $0x188] sm:$0x80]  ;;  %v1316_v24 = vld [vmem:[#allocation4 + $0x1a0] sm:$0x1]  ;;  %v1317_v8 = vld [vmem:[#allocation4 + $0x1a8] sm:$0x1] }
 0x388   :  { %v1314_v35 = vld [vmem:[#allocation4 + $0x190] sm:$0x80] }
 0x389   :  { %v1235_v45 = vadd.f32 %v1231_v3, %v1198_v53  ;;  %v1200_v1 = vadd.f32 %v1196_v25, %v1148_v40  ;;  %v1201_v15 = vadd.f32 %v1197_v41, %v1149_v39  ;;  %v1240_v5 = vpop.permute.xlu0 %1239  ;;  %v1205_v44 = vpop.permute.xlu1 %1204  ;;  %v1312_v53 = vld [vmem:[#allocation4 + $0x180] sm:$0x80]  ;;  %v1289_v40 = vld [vmem:[#allocation4 + $0x188] sm:$0x60]  ;;  %v1290_v3 = vld [vmem:[#allocation4 + $0x190] sm:$0x60] }
 0x38a   :  { %v1213_v50 = vsel %vm1210_vm1, %v1203_v31, %v1205_v44  ;;  %v1328_v19 = vrot.slane %v1312_v53, 7  ;;  %v1297_v36 = vrot.slane %v1289_v40, 5  ;;  %v1291_v25 = vld [vmem:[#allocation4 + $0x198] sm:$0x60]  ;;  %v1318_v41 = vld [vmem:[#allocation4 + $0x1b0] sm:$0x1] }
 0x38b   :  { %v1232_v46 = vmul.f32 %v1224_v42, %v1213_v50  ;;  %1843 = vperm.xlu1 %2081, %v1840_v21   ;;  %v1332_v50 = vrot.slane %v1317_v8, 7  ;;  %v1335_v23 = vrot.slane %v1318_v41, 7 }
 0x38d   :  { %v1236_v38 = vadd.f32 %v1232_v46, %v1199_v34  ;;  %v1246_v16 = vpop.permute.xlu0 %1245  ;;  %v1207_v13 = vpop.permute.xlu1 %1206  ;;  %v1334_v46 = vrot.slane %v1314_v35, 7 }
 0x38e   :  { %v1251_v20 = vsel %vm1247_vm2, %v1246_v16, %v1240_v5  ;;  %v1211_v47 = vsel %vm1210_vm1, %v1207_v13, %v1209_v59  ;;  %v1212_v48 = vsel %vm1210_vm1, %v1205_v44, %v1207_v13  ;;  %v1331_v44 = vrot.slane %v1313_v0, 7 }
 0x38f   :  { %v1268_v37 = vmul.f32 %v1260_v51, %v1251_v20  ;;  %v1233_v26 = vmul.f32 %v1225_v58, %v1212_v48  ;;  %v1234_v54 = vmul.f32 %v1226_v55, %v1211_v47  ;;  %v1298_v58 = vrot.slane %v1290_v3, 5 }
 0x390   :  { %v1299_v55 = vrot.slane %v1291_v25, 5  ;;  %v1333_v52 = vsel %vm76_vm0, %v1331_v44, %v1332_v50 }
 0x391   :  { %v1272_v17 = vadd.f32 %v1268_v37, %v1235_v45  ;;  %v1237_v32 = vadd.f32 %v1233_v26, %v1200_v1  ;;  %v1238_v28 = vadd.f32 %v1234_v54, %v1201_v15  ;;  %v1277_v61 = vpop.permute.xlu0 %1276  ;;  %v1242_v27 = vpop.permute.xlu1 %1241  ;;  %v1329_v45 = vrot.slane %v1316_v24, 7  ;;  %v1315_v1 = vld [vmem:[#allocation4 + $0x198] sm:$0x80]  ;;  %v1319_v15 = vld [vmem:[#allocation4 + $0x1b8] sm:$0x1] }
 0x392   :  { %v1250_v56 = vsel %vm1247_vm2, %v1240_v5, %v1242_v27  ;;  %v1337_v13 = vrot.slane %v1315_v1, 7  ;;  %v1338_v20 = vrot.slane %v1319_v15, 7  ;;  %v1404_v1 = vld [vmem:[#allocation4 + $0x1b8] sm:$0x18] }
 0x393   :  { %v1269_v43 = vmul.f32 %v1261_v63, %v1250_v56  ;;  %v1330_v63 = vsel %vm76_vm0, %v1328_v19, %v1329_v45  ;;  %v1401_v19 = vld [vmem:[#allocation4 + $0x1a0] sm:$0x18]  ;;  %v1403_v45 = vld [vmem:[#allocation4 + $0x1b0] sm:$0x18] }
 0x394   :  { %v1339_v56 = vsel %vm76_vm0, %v1337_v13, %v1338_v20  ;;  %v1344_v40 = vmul.f32 %v1330_v63, %v2564_v12  ;;  %v1409_v41 = vrot.slane %v1401_v19, 3  ;;  %v2945_v19 = vld [vmem:[#allocation4 + $0x1a0] sm:$0x80]  ;;  %v3028_v12 = vld [vmem:[#allocation4 + $0x1f8] sm:$0x6] }
 0x395   :  { %v1273_v39 = vadd.f32 %v1269_v43, %v1236_v38  ;;  %v1283_v31 = vpop.permute.xlu0 %1282  ;;  %v1244_v33 = vpop.permute.xlu1 %1243  ;;  %v1364_v38 = vld [vmem:[#allocation4 + $0x1a0] sm:$0x6]  ;;  %v1347_v8 = vmul.f32 %v1339_v56, %v2566_v29  ;;  %v1643_v29 = vld [vmem:[#allocation4 + $0x1f8] sm:$0x1]  ;;  %3456 = vst [vmem:[#allocation32_spill] sm:$0xff] %v3028_v12 }
 0x396   :  { %v1287_v30 = vsel %vm217_vm4, %v1283_v31, %v1277_v61  ;;  %v1248_v60 = vsel %vm1247_vm2, %v1244_v33, %v1246_v16  ;;  %v1249_v6 = vsel %vm1247_vm2, %v1242_v27, %v1244_v33  ;;  %v1365_v16 = vld [vmem:[#allocation4 + $0x1a8] sm:$0x6]  ;;  %v1336_v27 = vsel %vm76_vm0, %v1334_v46, %v1335_v23 }
 0x397   :  { %v1304_v34 = vmul.f32 %v1296_v57, %v1287_v30  ;;  %v1270_v59 = vmul.f32 %v1262_v22, %v1249_v6  ;;  %v1271_v7 = vmul.f32 %v1263_v49, %v1248_v60  ;;  %v1345_v49 = vmul.f32 %v1333_v52, %v2570_v4  ;;  %v3026_v4 = vld [vmem:[#allocation4 + $0x1f0] sm:$0x6] }
 0x398   :  { %3455 = vst [vmem:[#allocation31_spill] sm:$0xff] %v3026_v4  ;;  %v1806_v4 = vld [vmem:[#allocation4 + $0x210] sm:$0x1] }
 0x399   :  { %v1308_v42 = vadd.f32 %v1304_v34, %v1272_v17  ;;  %v1274_v21 = vadd.f32 %v1270_v59, %v1237_v32  ;;  %v1275_v9 = vadd.f32 %v1271_v7, %v1238_v28  ;;  %v1353_v2 = vpop.permute.xlu0 %1352  ;;  %v1279_v10 = vpop.permute.xlu1 %1278  ;;  %v1372_v17 = vrot.slane %v1364_v38, 1  ;;  %v1366_v28 = vld [vmem:[#allocation4 + $0x1b0] sm:$0x6] }
 0x39a   :  { %v1286_v5 = vsel %vm217_vm4, %v1277_v61, %v1279_v10  ;;  %v1373_v32 = vrot.slane %v1365_v16, 1  ;;  %v1367_v61 = vld [vmem:[#allocation4 + $0x1b8] sm:$0x6]  ;;  %v1374_v33 = vrot.slane %v1366_v28, 1 }
 0x39b   :  { %v1305_v51 = vmul.f32 %v1297_v36, %v1286_v5  ;;  %v1375_v30 = vrot.slane %v1367_v61, 1  ;;  %v1348_v6 = vadd.f32 %v1344_v40, %v1308_v42  ;;  %v1346_v36 = vmul.f32 %v1336_v27, %v2574_v62  ;;  %v2930_v40 = vld [vmem:[#allocation4 + $0x1a8] sm:$0x18]  ;;  %v3024_v62 = vld [vmem:[#allocation4 + $0x1e8] sm:$0x6] }
 0x39c   :  { %3454 = vst [vmem:[#allocation30_spill] sm:$0xff] %v3024_v62  ;;  %v1802_v62 = vld [vmem:[#allocation4 + $0x1f0] sm:$0x80]  ;;  %v3470_v12 = vrot.slane %v2930_v40, 3 }
 0x39d   :  { %v1309_v47 = vadd.f32 %v1305_v51, %v1273_v39  ;;  %v1357_v48 = vpop.permute.xlu0 %1356  ;;  %v1281_v37 = vpop.permute.xlu1 %1280  ;;  %v1411_v51 = vrot.slane %v1403_v45, 3 }
 0x39e   :  { %v1284_v26 = vsel %vm217_vm4, %v1281_v37, %v1283_v31  ;;  %v1285_v54 = vsel %vm217_vm4, %v1279_v10, %v1281_v37  ;;  %vm1433_vm4 = vcmp.lt.s32.totalorder %v2285_v18, 114 }
 0x39f   :  { %v1306_v11 = vmul.f32 %v1298_v58, %v1285_v54  ;;  %v1307_v14 = vmul.f32 %v1299_v55, %v1284_v26  ;;  %v1349_v60 = vadd.f32 %v1345_v49, %v1309_v47  ;;  %v1412_v58 = vrot.slane %v1404_v1, 3  ;;  %v2969_v1 = vld [vmem:[#allocation4 + $0x1c8] sm:$0x6] }
 0x3a1   :  { %v1310_v43 = vadd.f32 %v1306_v11, %v1274_v21  ;;  %v1311_v57 = vadd.f32 %v1307_v14, %v1275_v9  ;;  %v1389_v22 = vpop.permute.xlu0 %1388  ;;  %v1355_v53 = vpop.permute.xlu1 %1354 }
 0x3a2   :  { %v1361_v39 = vsel %vm260_vm5, %v1355_v53, %v1357_v48  ;;  %v1362_v31 = vsel %vm260_vm5, %v1353_v2, %v1355_v53 }
 0x3a3   :  { %v1380_v0 = vmul.f32 %v1372_v17, %v1362_v31  ;;  %v1381_v24 = vmul.f32 %v1373_v32, %v1361_v39  ;;  %v1350_v42 = vadd.f32 %v1346_v36, %v1310_v43  ;;  %v1351_v21 = vadd.f32 %v1347_v8, %v1311_v57  ;;  %v2932_v39 = vld [vmem:[#allocation4 + $0x1a0] sm:$0x60]  ;;  %v2934_v31 = vld [vmem:[#allocation4 + $0x1a8] sm:$0x60]  ;;  %v2949_v36 = vld [vmem:[#allocation4 + $0x1c0] sm:$0x1] }
 0x3a4   :  { %v2951_v8 = vld [vmem:[#allocation4 + $0x1c8] sm:$0x1] }
 0x3a5   :  { %v1384_v34 = vadd.f32 %v1380_v0, %v1348_v6  ;;  %v2870_v59 = vadd.f32 %v1381_v24, %v1349_v60  ;;  %v2872_v7 = vpop.permute.xlu0 %1392  ;;  %v1359_v35 = vpop.permute.xlu1 %1358  ;;  %v2943_v24 = vld [vmem:[#allocation4 + $0x1b0] sm:$0x60]  ;;  %v2995_v0 = vld [vmem:[#allocation4 + $0x1d8] sm:$0x18]  ;;  %v2997_v6 = vld [vmem:[#allocation4 + $0x1c0] sm:$0x60] }
 0x3a6   :  { %v1360_v3 = vsel %vm260_vm5, %v1357_v48, %v1359_v35  ;;  %v1363_v25 = vsel %vm260_vm5, %v1359_v35, %v1353_v2  ;;  %v1441_v48 = vld [vmem:[#allocation4 + $0x1b8] sm:$0x60]  ;;  %v2953_v35 = vld [vmem:[#allocation4 + $0x1b0] sm:$0x80]  ;;  %3445 = vst [vmem:[#allocation21_spill] sm:$0xff] %v2995_v0  ;;  %3446 = vst [vmem:[#allocation22_spill] sm:$0xff] %v2997_v6 }
 0x3a7   :  { %v1382_v9 = vmul.f32 %v1374_v33, %v1360_v3  ;;  %v1383_v10 = vmul.f32 %v1375_v30, %v1363_v25  ;;  %v1449_v52 = vrot.slane %v1441_v48, 5  ;;  %v2955_v3 = vld [vmem:[#allocation4 + $0x1b8] sm:$0x80]  ;;  %v2957_v25 = vld [vmem:[#allocation4 + $0x1d0] sm:$0x1]  ;;  %v3462_v6 = vrot.slane %v2945_v19, 7 }
 0x3a8   :  { %v3001_v60 = vld [vmem:[#allocation4 + $0x1d0] sm:$0x60]  ;;  %v1636_v48 = vld [vmem:[#allocation4 + $0x1c0] sm:$0x80]  ;;  %v3022_v0 = vld [vmem:[#allocation4 + $0x1e0] sm:$0x6] }
 0x3a9   :  { %v1386_v15 = vadd.f32 %v1382_v9, %v1350_v42  ;;  %v1387_v5 = vadd.f32 %v1383_v10, %v1351_v21  ;;  %v2881_v44 = vpop.permute.xlu0 %1425  ;;  %v2883_v50 = vpop.permute.xlu1 %1390  ;;  %v2961_v42 = vld [vmem:[#allocation4 + $0x1c0] sm:$0x6]  ;;  %v2993_v10 = vld [vmem:[#allocation4 + $0x1d0] sm:$0x18]  ;;  %3448 = vst [vmem:[#allocation24_spill] sm:$0xff] %v3001_v60  ;;  %v3468_v19 = vrot.slane %v2955_v3, 7 }
 0x3aa   :  { %v1399_v46 = vsel %vm1396_vm3, %v1389_v22, %v2883_v50  ;;  %3444 = vst [vmem:[#allocation20_spill] sm:$0xff] %v2993_v10  ;;  %vm1594_vm5 = vcmp.lt.s32.totalorder %v2285_v18, 110 }
 0x3ab   :  { %v1417_v2 = vmul.f32 %v1409_v41, %v1399_v46  ;;  %v2959_v41 = vld [vmem:[#allocation4 + $0x1d8] sm:$0x1] }
 0x3ad   :  { %v2888_v55 = vadd.f32 %v1417_v2, %v1384_v34  ;;  %v2890_v23 = vpop.permute.xlu0 %1429  ;;  %v1395_v38 = vpop.permute.xlu1 %1394  ;;  %v2947_v34 = vld [vmem:[#allocation4 + $0x1a8] sm:$0x80]  ;;  %v1639_v2 = vld [vmem:[#allocation4 + $0x1d8] sm:$0x80] }
 0x3ae   :  { %v1397_v16 = vsel %vm1396_vm3, %v2872_v7, %v1395_v38  ;;  %v1400_v13 = vsel %vm1396_vm3, %v1395_v38, %v1389_v22  ;;  %v1637_v38 = vld [vmem:[#allocation4 + $0x1c8] sm:$0x80]  ;;  %v1661_v60 = vrot.slane %v1639_v2, 7  ;;  %v3461_v2 = vrot.slane %v2949_v36, 7 }
 0x3af   :  { %v1419_v20 = vmul.f32 %v1411_v51, %v1397_v16  ;;  %v1420_v47 = vmul.f32 %v1412_v58, %v1400_v13  ;;  %v2999_v13 = vld [vmem:[#allocation4 + $0x1c8] sm:$0x60]  ;;  %v1640_v16 = vld [vmem:[#allocation4 + $0x1e0] sm:$0x1]  ;;  %v1652_v58 = vrot.slane %v1636_v48, 7  ;;  %v1655_v46 = vrot.slane %v1637_v38, 7 }
 0x3b0   :  { %3447 = vst [vmem:[#allocation23_spill] sm:$0xff] %v2999_v13  ;;  %v3030_v51 = vld [vmem:[#allocation4 + $0x1e0] sm:$0x18]  ;;  %v3032_v48 = vld [vmem:[#allocation4 + $0x1e8] sm:$0x18]  ;;  %v1662_v13 = vrot.slane %v1643_v29, 7 }
 0x3b1   :  { %v2897_v37 = vadd.f32 %v1419_v20, %v1386_v15  ;;  %v1424_v26 = vadd.f32 %v1420_v47, %v1387_v5  ;;  %v2899_v54 = vpop.permute.xlu0 %1462  ;;  %v2901_v63 = vpop.permute.xlu1 %1427  ;;  %v2971_v15 = vld [vmem:[#allocation4 + $0x1d0] sm:$0x6]  ;;  %v2981_v20 = vld [vmem:[#allocation4 + $0x1d8] sm:$0x6]  ;;  %v3003_v47 = vld [vmem:[#allocation4 + $0x1d8] sm:$0x60] }
 0x3b2   :  { %3439 = vst [vmem:[#allocation15_spill] sm:$0xff] %v2981_v20  ;;  %3449 = vst [vmem:[#allocation25_spill] sm:$0xff] %v3003_v47  ;;  %v3034_v47 = vld [vmem:[#allocation4 + $0x1f0] sm:$0x18]  ;;  %v3046_v20 = vld [vmem:[#allocation4 + $0x1f8] sm:$0x18] }
 0x3b3   :  { %3457 = vst [vmem:[#allocation33_spill] sm:$0xff] %v3030_v51  ;;  %3458 = vst [vmem:[#allocation34_spill] sm:$0xff] %v3032_v48  ;;  %v3465_v48 = vrot.slane %v2957_v25, 7  ;;  %v3466_v29 = vrot.slane %v2953_v35, 7  ;;  %v3467_v36 = vrot.slane %v2959_v41, 7  ;;  %v1398_v25 = vsel %vm1396_vm3, %v2883_v50, %v2872_v7 }
 0x3b4   :  { %3459 = vst [vmem:[#allocation35_spill] sm:$0xff] %v3034_v47  ;;  %3460 = vst [vmem:[#allocation36_spill] sm:$0xff] %v3046_v20  ;;  %v1800_v51 = vld [vmem:[#allocation4 + $0x1e0] sm:$0x80]  ;;  %v3095_v7 = vsel %vm76_vm0, %v1661_v60, %v1662_v13  ;;  %v3097_v50 = vld [vmem:[#allocation4 + $0x1f8] sm:$0x60]  ;;  %v1436_v60 = vsel %vm1433_vm4, %v2881_v44, %v2901_v63 }
 0x3b5   :  { %v2904_v11 = vpop.permute.xlu0 %1466  ;;  %v2906_v14 = vpop.permute.xlu1 %1431  ;;  %v1498_v47 = vsel %vm76_vm0, %v3466_v29, %v3465_v48  ;;  %3469 = vst [vmem:[#allocation37_spill] sm:$0xff] %v3097_v50  ;;  %v1801_v29 = vld [vmem:[#allocation4 + $0x1e8] sm:$0x80]  ;;  %v1816_v3 = vrot.slane %v1800_v51, 7 }
 0x3b6   :  { %v1437_v17 = vsel %vm1433_vm4, %v2906_v14, %v2881_v44 }
 0x3b7   :  { %v1457_v32 = vmul.f32 %v1449_v52, %v1437_v17  ;;  %v2987_v52 = vld [vmem:[#allocation4 + $0x1c8] sm:$0x18] }
 0x3b8   :  { %3441 = vst [vmem:[#allocation17_spill] sm:$0xff] %v2987_v52  ;;  %v1492_v52 = vsel %vm76_vm0, %v3462_v6, %v3461_v2  ;;  %v1501_v6 = vsel %vm76_vm0, %v3468_v19, %v3467_v36 }
 0x3b9   :  { %v2912_v28 = vadd.f32 %v1457_v32, %v1424_v26  ;;  %v2914_v61 = vpop.permute.xlu0 %1514  ;;  %v2916_v27 = vpop.permute.xlu1 %1464  ;;  %v2985_v26 = vld [vmem:[#allocation4 + $0x1c0] sm:$0x18] }
 0x3ba   :  { %3440 = vst [vmem:[#allocation16_spill] sm:$0xff] %v2985_v26  ;;  %v1803_v26 = vld [vmem:[#allocation4 + $0x1f8] sm:$0x80]  ;;  %v1471_v44 = vsel %vm319_vm6, %v2916_v27, %v2904_v11 }
 0x3bb   :  { %3436 = vst [vmem:[#allocation12_spill] sm:$0xff] %v2912_v28  ;;  %v1825_v36 = vrot.slane %v1803_v26, 7  ;;  %v3473_v26 = vrot.slane %v2943_v24, 5 }
 0x3bd   :  { %v2918_v56 = vpop.permute.xlu0 %1518  ;;  %v2920_v43 = vpop.permute.xlu1 %1468 }
 0x3c1   :  { %v2922_v57 = vpop.permute.xlu0 %1550  ;;  %v2924_v22 = vpop.permute.xlu1 %1516 }
 0x3c5   :  { %v2926_v49 = vpop.permute.xlu0 %1554  ;;  %v2928_v53 = vpop.permute.xlu1 %1520 }
 0x3c9   :  { %v2936_v33 = vpop.permute.xlu0 %1586  ;;  %v2938_v30 = vpop.permute.xlu1 %1552 }
 0x3ca   :  { %3437 = vst [vmem:[#allocation13_spill] sm:$0xff] %v2936_v33  ;;  %v1653_v33 = vrot.slane %v1640_v16, 7 }
 0x3cc   :  { %v3072_v2 = vsel %vm76_vm0, %v1652_v58, %v1653_v33  ;;  %v3089_v58 = vld [vmem:[#allocation4 + $0x1f0] sm:$0x60]  ;;  %v1418_v33 = vmul.f32 %v3470_v12, %v1398_v25  ;;  %v3472_v25 = vrot.slane %v2934_v31, 5 }
 0x3cd   :  { %v2963_v21 = vpop.permute.xlu0 %1590  ;;  %v2965_v9 = vpop.permute.xlu1 %1556 }
 0x3ce   :  { %3438 = vst [vmem:[#allocation14_spill] sm:$0xff] %v2963_v21  ;;  %v1642_v21 = vld [vmem:[#allocation4 + $0x1f0] sm:$0x1]  ;;  %v1422_v51 = vadd.f32 %v1418_v33, %v2870_v59  ;;  %v1523_v59 = vsel %vm362_vm7, %v2924_v22, %v2918_v56  ;;  %v1524_v33 = vsel %vm362_vm7, %v2914_v61, %v2924_v22  ;;  %v3474_v22 = vrot.slane %v2961_v42, 1 }
 0x3d1   :  { %v2989_v17 = vpop.permute.xlu0 %1623  ;;  %v2991_v32 = vpop.permute.xlu1 %1588 }
 0x3d2   :  { %3442 = vst [vmem:[#allocation18_spill] sm:$0xff] %v2989_v17  ;;  %3443 = vst [vmem:[#allocation19_spill] sm:$0xff] %v2991_v32  ;;  %v1641_v17 = vld [vmem:[#allocation4 + $0x1e8] sm:$0x1]  ;;  %v1638_v32 = vld [vmem:[#allocation4 + $0x1d0] sm:$0x80] }
 0x3d3   :  { %v1656_v16 = vrot.slane %v1641_v17, 7  ;;  %v1658_v38 = vrot.slane %v1638_v32, 7  ;;  %v3463_v17 = vrot.slane %v2951_v8, 7  ;;  %v3464_v32 = vrot.slane %v2947_v34, 7  ;;  %v1807_v8 = vld [vmem:[#allocation4 + $0x218] sm:$0x1] }
 0x3d4   :  { %v1804_v34 = vld [vmem:[#allocation4 + $0x200] sm:$0x1]  ;;  %v1826_v19 = vrot.slane %v1807_v8, 7  ;;  %v3471_v8 = vrot.slane %v2932_v39, 5 }
 0x3d5   :  { %v3009_v45 = vpop.permute.xlu0 %1627  ;;  %v3011_v5 = vpop.permute.xlu1 %1592  ;;  %v1495_v28 = vsel %vm76_vm0, %v3464_v32, %v3463_v17  ;;  %v3079_v35 = vsel %vm76_vm0, %v1655_v46, %v1656_v16  ;;  %v3086_v17 = vld [vmem:[#allocation4 + $0x1e8] sm:$0x60]  ;;  %v1822_v46 = vrot.slane %v1802_v62, 7  ;;  %v1823_v16 = vrot.slane %v1806_v4, 7  ;;  %v1805_v62 = vld [vmem:[#allocation4 + $0x208] sm:$0x1] }
 0x3d6   :  { %3450 = vst [vmem:[#allocation26_spill] sm:$0xff] %v3009_v45  ;;  %3451 = vst [vmem:[#allocation27_spill] sm:$0xff] %v3011_v5  ;;  %v1817_v20 = vrot.slane %v1804_v34, 7  ;;  %v1434_v4 = vsel %vm1433_vm4, %v2890_v23, %v2906_v14  ;;  %v1473_v14 = vsel %vm319_vm6, %v2920_v43, %v2899_v54  ;;  %v1454_v34 = vmul.f32 %v3471_v8, %v1436_v60 }
 0x3d7   :  { %v1456_v13 = vmul.f32 %v3473_v26, %v1434_v4  ;;  %v3149_v50 = vsel %vm76_vm0, %v1825_v36, %v1826_v19  ;;  %v1507_v39 = vmul.f32 %v1495_v28, %v1471_v44  ;;  %v1522_v28 = vsel %vm362_vm7, %v2918_v56, %v2928_v53 }
 0x3d8   :  { %v1559_v56 = vsel %vm421_vm8, %v2938_v30, %v2926_v49  ;;  %v3476_v36 = vrot.slane %v2971_v15, 1 }
 0x3d9   :  { %v3018_v45 = vpop.permute.xlu0 %1676  ;;  %v3020_v5 = vpop.permute.xlu1 %1625 }
 0x3da   :  { %3452 = vst [vmem:[#allocation28_spill] sm:$0xff] %v3018_v45  ;;  %3453 = vst [vmem:[#allocation29_spill] sm:$0xff] %v3020_v5  ;;  %v1659_v45 = vrot.slane %v1642_v21, 7  ;;  %v3049_v21 = vld [vmem:[#allocation4 + $0x1e0] sm:$0x60]  ;;  %v1544_v19 = vmul.f32 %v3476_v36, %v1522_v28  ;;  %v3494_v36 = vld [vmem:[#allocation18_spill] sm:$0xff] }
 0x3dc   :  { %v3092_v32 = vsel %vm76_vm0, %v1658_v38, %v1659_v45  ;;  %v1435_v45 = vsel %vm1433_vm4, %v2901_v63, %v2890_v23  ;;  %v1819_v38 = vrot.slane %v1801_v29, 7  ;;  %v1472_v23 = vsel %vm319_vm6, %v2899_v54, %v2916_v27 }
 0x3dd   :  { %v3037_v5 = vpop.permute.xlu0 %1680  ;;  %v3039_v10 = vpop.permute.xlu1 %1629  ;;  %v1470_v63 = vsel %vm319_vm6, %v2904_v11, %v2920_v43  ;;  %v1455_v29 = vmul.f32 %v3472_v25, %v1435_v45  ;;  %v1820_v27 = vrot.slane %v1805_v62, 7  ;;  %v3146_v11 = vsel %vm76_vm0, %v1822_v46, %v1823_v16  ;;  %v3486_v25 = vld [vmem:[#allocation21_spill] sm:$0xff] }
 0x3de   :  { %v3152_v54 = vsel %vm76_vm0, %v1816_v3, %v1817_v20  ;;  %v1506_v43 = vmul.f32 %v1492_v52, %v1472_v23  ;;  %v1508_v31 = vmul.f32 %v1498_v47, %v1470_v63  ;;  %v1509_v45 = vmul.f32 %v1501_v6, %v1473_v14  ;;  %v3482_v23 = vld [vmem:[#allocation17_spill] sm:$0xff]  ;;  %v3484_v14 = vld [vmem:[#allocation20_spill] sm:$0xff] }
 0x3df   :  { %v1525_v20 = vsel %vm362_vm7, %v2928_v53, %v2914_v61  ;;  %v1458_v47 = vadd.f32 %v1454_v34, %v2888_v55  ;;  %v1459_v52 = vadd.f32 %v1455_v29, %v1422_v51  ;;  %v1460_v6 = vadd.f32 %v1456_v13, %v2897_v37 }
 0x3e0   :  { %vm1684_vm6 = vcmp.lt.s32.totalorder %v2285_v18, 97  ;;  %v3178_v3 = vsel %vm76_vm0, %v1819_v38, %v1820_v27  ;;  %v1560_v61 = vsel %vm421_vm8, %v2922_v57, %v2938_v30  ;;  %v1558_v55 = vsel %vm421_vm8, %v2926_v49, %v2965_v9  ;;  %v3477_v30 = vld [vmem:[#allocation15_spill] sm:$0xff]  ;;  %v3480_v38 = vld [vmem:[#allocation16_spill] sm:$0xff] }
 0x3e1   :  { %v3081_v48 = vpop.permute.xlu0 %1713  ;;  %v3083_v41 = vpop.permute.xlu1 %1678  ;;  %v1561_v37 = vsel %vm421_vm8, %v2965_v9, %v2922_v57  ;;  %v1542_v53 = vmul.f32 %v3474_v22, %v1524_v33  ;;  %v3475_v46 = vrot.slane %v2969_v1, 1  ;;  %v3478_v4 = vrot.slane %v3477_v30, 1  ;;  %v3479_v9 = vld [vmem:[#allocation12_spill] sm:$0xff]  ;;  %v3489_v33 = vld [vmem:[#allocation19_spill] sm:$0xff]  ;;  %v3493_v22 = vld [vmem:[#allocation29_spill] sm:$0xff] }
 0x3e2   :  { %vm1721_vm7 = vcmp.lt.s32.totalorder %v2285_v18, 96  ;;  %v1510_v13 = vadd.f32 %v1506_v43, %v1458_v47  ;;  %v1511_v26 = vadd.f32 %v1507_v39, %v1459_v52  ;;  %v1512_v57 = vadd.f32 %v1508_v31, %v1460_v6  ;;  %v3490_v39 = vld [vmem:[#allocation13_spill] sm:$0xff] }
 0x3e3   :  { %v1543_v16 = vmul.f32 %v3475_v46, %v1523_v59  ;;  %v1545_v62 = vmul.f32 %v3478_v4, %v1525_v20  ;;  %v1513_v42 = vadd.f32 %v1509_v45, %v3479_v9  ;;  %v3481_v44 = vrot.slane %v3480_v38, 3  ;;  %v3488_v59 = vld [vmem:[#allocation14_spill] sm:$0xff]  ;;  %v3491_v45 = vld [vmem:[#allocation27_spill] sm:$0xff]  ;;  %v3499_v9 = vld [vmem:[#allocation24_spill] sm:$0xff] }
 0x3e4   :  { %v3483_v63 = vrot.slane %v3482_v23, 3  ;;  %v3485_v8 = vrot.slane %v3484_v14, 3  ;;  %v3487_v29 = vrot.slane %v3486_v25, 3  ;;  %v1596_v43 = vsel %vm1594_vm5, %v3489_v33, %v3488_v59 }
 0x3e5   :  { %v3114_v40 = vpop.permute.xlu0 %1717  ;;  %v3116_v12 = vpop.permute.xlu1 %1682  ;;  %v1578_v1 = vmul.f32 %v3481_v44, %v1560_v61  ;;  %v1597_v31 = vsel %vm1594_vm5, %v3490_v39, %v3489_v33  ;;  %v1595_v28 = vsel %vm1594_vm5, %v3488_v59, %v3491_v45  ;;  %v1598_v20 = vsel %vm1594_vm5, %v3491_v45, %v3490_v39  ;;  %v3501_v44 = vld [vmem:[#allocation25_spill] sm:$0xff] }
 0x3e6   :  { %v1579_v15 = vmul.f32 %v3483_v63, %v1559_v56  ;;  %v1580_v34 = vmul.f32 %v3485_v8, %v1558_v55  ;;  %v1581_v27 = vmul.f32 %v3487_v29, %v1561_v37  ;;  %v1546_v47 = vadd.f32 %v1542_v53, %v1510_v13  ;;  %v3492_v37 = vld [vmem:[#allocation26_spill] sm:$0xff]  ;;  %v3497_v13 = vld [vmem:[#allocation23_spill] sm:$0xff] }
 0x3e7   :  { %v1547_v52 = vadd.f32 %v1543_v16, %v1511_v26  ;;  %v1548_v6 = vadd.f32 %v1544_v19, %v1512_v57  ;;  %v1549_v56 = vadd.f32 %v1545_v62, %v1513_v42  ;;  %vm1758_vm8 = vcmp.lt.s32.totalorder %v2285_v18, 95  ;;  %v3495_v19 = vld [vmem:[#allocation22_spill] sm:$0xff] }
 0x3e8   :  { %v1633_v46 = vsel %vm1631_vm10, %v3493_v22, %v3492_v37  ;;  %v1634_v30 = vsel %vm1631_vm10, %v3494_v36, %v3493_v22  ;;  %v1632_v53 = vsel %vm1631_vm10, %v3492_v37, %v3039_v10  ;;  %v1635_v16 = vsel %vm1631_vm10, %v3039_v10, %v3494_v36  ;;  %v3507_v37 = vld [vmem:[#allocation31_spill] sm:$0xff]  ;;  %v3509_v36 = vld [vmem:[#allocation32_spill] sm:$0xff] }
 0x3e9   :  { %v3154_v24 = vpop.permute.xlu0 %1750  ;;  %v3156_v60 = vpop.permute.xlu1 %1715  ;;  %v3496_v4 = vrot.slane %v3495_v19, 5  ;;  %v3498_v26 = vrot.slane %v3497_v13, 5  ;;  %v3500_v42 = vrot.slane %v3499_v9, 5  ;;  %v3502_v23 = vrot.slane %v3501_v44, 5 }
 0x3ea   :  { %v1582_v14 = vadd.f32 %v1578_v1, %v1546_v47  ;;  %v1583_v8 = vadd.f32 %v1579_v15, %v1547_v52  ;;  %v1584_v25 = vadd.f32 %v1580_v34, %v1548_v6  ;;  %v1585_v29 = vadd.f32 %v1581_v27, %v1549_v56  ;;  %v3503_v1 = vld [vmem:[#allocation28_spill] sm:$0xff]  ;;  %v3505_v52 = vld [vmem:[#allocation30_spill] sm:$0xff] }
 0x3eb   :  { %v1615_v62 = vmul.f32 %v3496_v4, %v1597_v31  ;;  %v1616_v57 = vmul.f32 %v3498_v26, %v1596_v43  ;;  %v1617_v38 = vmul.f32 %v3500_v42, %v1595_v28  ;;  %v1618_v63 = vmul.f32 %v3502_v23, %v1598_v20  ;;  %v3511_v4 = vld [vmem:[#allocation33_spill] sm:$0xff]  ;;  %v3515_v26 = vld [vmem:[#allocation35_spill] sm:$0xff]  ;;  %v3517_v42 = vld [vmem:[#allocation36_spill] sm:$0xff] }
 0x3ec   :  { %v1668_v10 = vmul.f32 %v3072_v2, %v1634_v30  ;;  %v1669_v59 = vmul.f32 %v3079_v35, %v1633_v46  ;;  %v1670_v33 = vmul.f32 %v3092_v32, %v1632_v53  ;;  %v1671_v43 = vmul.f32 %v3095_v7, %v1635_v16 }
 0x3ed   :  { %v3205_v49 = vpop.permute.xlu0 %1754  ;;  %v1720_v51 = vpop.permute.xlu1 %1719  ;;  %v1686_v45 = vsel %vm1684_vm6, %v3083_v41, %v3037_v5  ;;  %v1687_v15 = vsel %vm1684_vm6, %v3503_v1, %v3083_v41  ;;  %v1685_v2 = vsel %vm1684_vm6, %v3037_v5, %v3116_v12  ;;  %v1688_v35 = vsel %vm1684_vm6, %v3116_v12, %v3503_v1 }
 0x3ee   :  { %v1619_v32 = vadd.f32 %v1615_v62, %v1582_v14  ;;  %v1620_v7 = vadd.f32 %v1616_v57, %v1583_v8  ;;  %v1621_v34 = vadd.f32 %v1617_v38, %v1584_v25  ;;  %v1622_v27 = vadd.f32 %v1618_v63, %v1585_v29 }
 0x3ef   :  { %v1723_v28 = vsel %vm1721_vm7, %v3156_v60, %v3114_v40  ;;  %v1724_v41 = vsel %vm1721_vm7, %v3081_v48, %v3156_v60  ;;  %v1722_v5 = vsel %vm1721_vm7, %v3114_v40, %v1720_v51  ;;  %v1725_v12 = vsel %vm1721_vm7, %v1720_v51, %v3081_v48  ;;  %v3513_v48 = vld [vmem:[#allocation34_spill] sm:$0xff] }
 0x3f0   :  { %v3504_v20 = vrot.slane %v3022_v0, 1  ;;  %v3506_v6 = vrot.slane %v3505_v52, 1  ;;  %v3508_v22 = vrot.slane %v3507_v37, 1  ;;  %v3510_v30 = vrot.slane %v3509_v36, 1 }
 0x3f1   :  { %v1788_v61 = vpop.permute.xlu0 %1787  ;;  %v1753_v55 = vpop.permute.xlu1 %1752  ;;  %v1672_v53 = vadd.f32 %v1668_v10, %v1619_v32  ;;  %v1673_v16 = vadd.f32 %v1669_v59, %v1620_v7  ;;  %v1674_v19 = vadd.f32 %v1670_v33, %v1621_v34  ;;  %v1675_v40 = vadd.f32 %v1671_v43, %v1622_v27  ;;  %v3522_v7 = vld [vmem:[#allocation37_spill] sm:$0xff] }
 0x3f2   :  { %v1705_v47 = vmul.f32 %v3504_v20, %v1687_v15  ;;  %v1706_v56 = vmul.f32 %v3506_v6, %v1686_v45  ;;  %v1707_v46 = vmul.f32 %v3508_v22, %v1685_v2  ;;  %v1708_v60 = vmul.f32 %v3510_v30, %v1688_v35 }
 0x3f3   :  { %v3512_v62 = vrot.slane %v3511_v4, 3  ;;  %v3514_v51 = vrot.slane %v3513_v48, 3  ;;  %v3516_v57 = vrot.slane %v3515_v26, 3  ;;  %v3518_v38 = vrot.slane %v3517_v42, 3 }
 0x3f4   :  { %v1760_v14 = vsel %vm1758_vm8, %v1753_v55, %v3205_v49  ;;  %v1761_v8 = vsel %vm1758_vm8, %v3154_v24, %v1753_v55  ;;  %v1709_v10 = vadd.f32 %v1705_v47, %v1672_v53  ;;  %v1710_v59 = vadd.f32 %v1706_v56, %v1673_v16 }
 0x3f5   :  { %v1792_v39 = vpop.permute.xlu0 %1791  ;;  %v1757_v31 = vpop.permute.xlu1 %1756  ;;  %v1742_v13 = vmul.f32 %v3512_v62, %v1724_v41  ;;  %v1743_v0 = vmul.f32 %v3514_v51, %v1723_v28  ;;  %v1744_v9 = vmul.f32 %v3516_v57, %v1722_v5  ;;  %v1745_v44 = vmul.f32 %v3518_v38, %v1725_v12 }
 0x3f6   :  { %v1759_v25 = vsel %vm1758_vm8, %v3205_v49, %v1757_v31  ;;  %v1762_v29 = vsel %vm1758_vm8, %v1757_v31, %v3154_v24  ;;  %v1711_v33 = vadd.f32 %v1707_v46, %v1674_v19  ;;  %v1712_v43 = vadd.f32 %v1708_v60, %v1675_v40 }
 0x3f7   :  { %v3519_v15 = vrot.slane %v3049_v21, 5  ;;  %v3520_v24 = vrot.slane %v3086_v17, 5  ;;  %v3521_v35 = vrot.slane %v3089_v58, 5  ;;  %v3523_v34 = vrot.slane %v3522_v7, 5  ;;  %v1919_v7 = vld [vmem:[#allocation4 + $0x210] sm:$0xfe] }
 0x3f8   :  { %v1746_v28 = vadd.f32 %v1742_v13, %v1709_v10  ;;  %v1747_v41 = vadd.f32 %v1743_v0, %v1710_v59  ;;  %v1748_v5 = vadd.f32 %v1744_v9, %v1711_v33  ;;  %v1749_v12 = vadd.f32 %v1745_v44, %v1712_v43  ;;  %v1850_v59 = vld [vmem:[#allocation4 + $0xa0] sm:$0xc] }
 0x3f9   :  { %v1794_v23 = vpop.permute.xlu0 %1793  ;;  %v1790_v63 = vpop.permute.xlu1 %1789  ;;  %v1779_v2 = vmul.f32 %v3519_v15, %v1761_v8  ;;  %v1780_v31 = vmul.f32 %v3520_v24, %v1760_v14  ;;  %v1781_v32 = vmul.f32 %v3521_v35, %v1759_v25  ;;  %v1782_v27 = vmul.f32 %v3523_v34, %v1762_v29  ;;  %v1917_v24 = vld [vmem:[#allocation4 + $0x200] sm:$0xfe]  ;;  %v1921_v35 = vld [vmem:[#allocation4 + $0x220] sm:$0x1] }
 0x3fa   :  { %v1796_v45 = vsel %vm1795_vm11, %v1792_v39, %v1794_v23  ;;  %v1799_v1 = vsel %vm1795_vm11, %v1794_v23, %v1788_v61  ;;  %v1797_v55 = vsel %vm1795_vm11, %v1790_v63, %v1792_v39  ;;  %v1798_v49 = vsel %vm1795_vm11, %v1788_v61, %v1790_v63 }
 0x3fb   :  { %v1834_v39 = vmul.f32 %v3146_v11, %v1796_v45  ;;  %v1835_v18 = vmul.f32 %v3149_v50, %v1799_v1  ;;  %v1832_v21 = vmul.f32 %v3152_v54, %v1798_v49  ;;  %v1833_v61 = vmul.f32 %v3178_v3, %v1797_v55  ;;  %v1851_v55 = vld [vmem:[#allocation4 + $0xa0] sm:$0x30] }
 0x3fc   :  { %v1783_v17 = vadd.f32 %v1779_v2, %v1746_v28  ;;  %v1784_v20 = vadd.f32 %v1780_v31, %v1747_v41  ;;  %v1785_v47 = vadd.f32 %v1781_v32, %v1748_v5  ;;  %v1786_v58 = vadd.f32 %v1782_v27, %v1749_v12  ;;  %v1918_v31 = vld [vmem:[#allocation4 + $0x208] sm:$0xfe]  ;;  %v1922_v32 = vld [vmem:[#allocation4 + $0x228] sm:$0x1]  ;;  %v1920_v28 = vld [vmem:[#allocation4 + $0x218] sm:$0xfe] }
 0x3fd   :  { %v1934_v27 = vrot.slane %v1917_v24, 1  ;;  %v1923_v41 = vld [vmem:[#allocation4 + $0x230] sm:$0x1]  ;;  %v1924_v5 = vld [vmem:[#allocation4 + $0x238] sm:$0x1] }
 0x3fe   :  { %v1838_v52 = vadd.f32 %v1834_v39, %v1785_v47  ;;  %v1839_v6 = vadd.f32 %v1835_v18, %v1786_v58  ;;  %v1836_v56 = vadd.f32 %v1832_v21, %v1783_v17  ;;  %v1837_v37 = vadd.f32 %v1833_v61, %v1784_v20  ;;  %v1956_v12 = vld [vmem:[#allocation4 + $0x230] sm:$0x6]  ;;  %v1957_v17 = vld [vmem:[#allocation4 + $0x238] sm:$0x6]  ;;  %v1954_v20 = vld [vmem:[#allocation4 + $0x220] sm:$0x6] }
 0x3ff   :  { %v1935_v39 = vrot.slane %v1921_v35, 1  ;;  %v1937_v18 = vrot.slane %v1918_v31, 1  ;;  %v1938_v21 = vrot.slane %v1922_v32, 1  ;;  %v1940_v61 = vrot.slane %v1919_v7, 1  ;;  %v1955_v47 = vld [vmem:[#allocation4 + $0x228] sm:$0x6] }
 0x406   :  { %v1844_v22 = vpop.permute.xlu1 %1843 }
 0x407   :  { %v3340_v46 = vadd.f32 %v1844_v22, %v1836_v56  ;;  %v3342_v36 = vadd.f32 %v1844_v22, %v1837_v37  ;;  %v3344_v11 = vadd.f32 %v1844_v22, %v1838_v52  ;;  %v3346_v50 = vadd.f32 %v1844_v22, %v1839_v6 }
 0x408   :  { %v1941_v6 = vrot.slane %v1923_v41, 1  ;;  %v1943_v56 = vrot.slane %v1920_v28, 1  ;;  %v1944_v37 = vrot.slane %v1924_v5, 1 }
 0x409   :  { %v1862_v54 = vmul.f32 %v3340_v46, %v3340_v46  ;;  %v1863_v3 = vmul.f32 %v3342_v36, %v3342_v36  ;;  %v1853_v30 = vsel %vm1852_vm12, %v3340_v46, 0.0  ;;  %v1854_v60 = vsel %vm1852_vm12, %v3342_v36, 0.0 }
 0x40a   :  { %v1855_v53 = vadd.f32 %v1854_v60, %v1853_v30  ;;  %v1864_v16 = vmul.f32 %v3344_v11, %v3344_v11  ;;  %v1856_v19 = vsel %vm1852_vm12, %v3344_v11, 0.0  ;;  %v1865_v40 = vmul.f32 %v3346_v50, %v3346_v50 }
 0x40b   :  { %v1866_v4 = vsel %vm1852_vm12, %v1862_v54, 0.0  ;;  %v1867_v62 = vsel %vm1852_vm12, %v1863_v3, 0.0  ;;  %v1858_v51 = vsel %vm1852_vm12, %v3346_v50, 0.0  ;;  %v1964_v60 = vrot.slane %v1956_v12, 1 }
 0x40c   :  { %v1857_v13 = vadd.f32 %v1856_v19, %v1855_v53  ;;  %v1868_v48 = vadd.f32 %v1867_v62, %v1866_v4  ;;  %v1869_v0 = vsel %vm1852_vm12, %v1864_v16, 0.0  ;;  %v1871_v9 = vsel %vm1852_vm12, %v1865_v40, 0.0 }
 0x40d   :  { %v1965_v53 = vrot.slane %v1957_v17, 1  ;;  %v1962_v16 = vrot.slane %v1954_v20, 1  ;;  %v1963_v19 = vrot.slane %v1955_v47, 1 }
 0x40e   :  { %v1859_v26 = vadd.f32 %v1858_v51, %v1857_v13  ;;  %v1870_v57 = vadd.f32 %v1869_v0, %v1868_v48  ;;  %v1939_v48 = vsel %vm1933_vm13, %v1937_v18, %v1938_v21 }
 0x410   :  { %1860 = vadd.xlane.f32.xlu1 %v1859_v26  ;;  %v1872_v42 = vadd.f32 %v1871_v9, %v1870_v57 }
 0x412   :  { %1873 = vadd.xlane.f32.xlu0 %v1872_v42 }
 0x499   :  { %v1861_v38 = vpop.xlane.xlu1 %1860 }
 0x49a   :  { %v1875_v44 = vmul.f32 0.001953125, %v1861_v38 }
 0x49b   :  { %v1874_v23 = vpop.xlane.xlu0 %1873 }
 0x49c   :  { %v1877_v63 = vmul.f32 %v1875_v44, %v1875_v44  ;;  %v1876_v14 = vmul.f32 0.001953125, %v1874_v23 }
 0x49e   :  { %v1878_v8 = vsub.f32 %v1876_v14, %v1877_v63  ;;  %v3525_v63 = vld [vmem:[#allocation10_spill] sm:$0xff] }
 0x49f   :  { %v1951_v14 = vmul.f32 %v1939_v48, %v3525_v63 }
 0x4a0   :  { %v1879_v25 = vmax.f32 %v1878_v8, 0.0 }
 0x4a2   :  { %v1880_v29 = vadd.f32 1e-05, %v1879_v25 }
 0x4a4   :  { %2086 = vrsqrt.f32 %v1880_v29 }
 0x4b1   :  { %v2087_v10 = vpop.eup %2086 }
 0x4b2   :  { %v1883_v33 = vrot.slane %v2087_v10, 6 }
 0x4b4   :  { %v1885_v43 = vmul.f32 %v1883_v33, %v1850_v59 }
 0x4b6   :  { %1895 = vperm.xlu0 %2080, %v1885_v43   ;;  %v1887_v45 = vrot.slane %v1885_v43, 2  ;;  %v3526_v43 = vld [vmem:[#allocation11_spill] sm:$0xff] }
 0x4b8   :  { %v1889_v1 = vmul.f32 %v1887_v45, %v1875_v44  ;;  %v3524_v44 = vld [vmem:[#allocation8_spill] sm:$0xff] }
 0x4ba   :  { %v1891_v49 = vrot.slane %v1889_v1, 4  ;;  %v3527_v1 = vld [vmem:[#allocation9_spill] sm:$0xff] }
 0x4bc   :  { %v1893_v15 = vsub.f32 %v1851_v55, %v1891_v49 }
 0x4be   :  { %1905 = vperm.xlu1 %2081, %v1893_v15  }
 0x531   :  { %v1896_v2 = vpop.permute.xlu0 %1895 }
 0x532   :  { %v1897_v34 = vrot.slane %v1896_v2, 2 }
 0x534   :  { %v1899_v58 = vmul.f32 %v1897_v34, %v3340_v46  ;;  %v1900_v22 = vmul.f32 %v1897_v34, %v3342_v36  ;;  %v1901_v54 = vmul.f32 %v1897_v34, %v3344_v11  ;;  %v1902_v3 = vmul.f32 %v1897_v34, %v3346_v50 }
 0x535   :  { %v1936_v46 = vsel %vm1933_vm13, %v1934_v27, %v1935_v39  ;;  %v1942_v11 = vsel %vm1933_vm13, %v1940_v61, %v1941_v6  ;;  %v1945_v50 = vsel %vm1933_vm13, %v1943_v56, %v1944_v37 }
 0x536   :  { %v1950_v23 = vmul.f32 %v1936_v46, %v3524_v44  ;;  %v1952_v45 = vmul.f32 %v1942_v11, %v3526_v43  ;;  %v1953_v55 = vmul.f32 %v1945_v50, %v3527_v1 }
 0x538   :  { %v1974_v49 = vadd.f32 %v1951_v14, %v1950_v23  ;;  %v1996_v15 = vadd.f32 %v1953_v55, %v1952_v45 }
 0x539   :  { %v1906_v52 = vpop.permute.xlu1 %1905 }
 0x53a   :  { %v1907_v30 = vrot.slane %v1906_v52, 4 }
 0x53c   :  { %v1909_v40 = vadd.f32 %v1907_v30, %v1899_v58  ;;  %v1910_v4 = vadd.f32 %v1907_v30, %v1900_v22  ;;  %v1911_v62 = vadd.f32 %v1907_v30, %v1901_v54  ;;  %v1912_v13 = vadd.f32 %v1907_v30, %v1902_v3 }
 0x53e   :  { %v1915_v51 = vmax.f32 %v1911_v62, 0.0  ;;  %v1916_v0 = vmax.f32 %v1912_v13, 0.0  ;;  %v1913_v36 = vmax.f32 %v1909_v40, 0.0  ;;  %v1914_v26 = vmax.f32 %v1910_v4, 0.0 }
 0x540   :  { %v1972_v57 = vmul.f32 %v1964_v60, %v1915_v51  ;;  %v1973_v9 = vmul.f32 %v1965_v53, %v1916_v0  ;;  %v1970_v42 = vmul.f32 %v1962_v16, %v1913_v36  ;;  %v1971_v38 = vmul.f32 %v1963_v19, %v1914_v26  ;;  %v2019_v19 = vld [vmem:[#allocation4 + $0xa6] ss:$0 sm:$0xff] }
 0x542   :  { %v2005_v8 = vsel %vm1852_vm12, %v1972_v57, 0.0  ;;  %v2006_v25 = vsel %vm1852_vm12, %v1973_v9, 0.0  ;;  %v1983_v29 = vsel %vm1852_vm12, %v1970_v42, 0.0  ;;  %v1984_v10 = vsel %vm1852_vm12, %v1971_v38, 0.0 }
 0x543   :  { %v2007_v59 = vadd.f32 %v2006_v25, %v2005_v8  ;;  %v1985_v33 = vadd.f32 %v1984_v10, %v1983_v29 }
 0x545   :  { %2008 = vadd.xlane.f32.xlu0 %v2007_v59  ;;  %1986 = vadd.xlane.f32.xlu1 %v1985_v33 }
 0x549   :  { %1975 = vadd.xlane.f32.xlu0 %v1974_v49  ;;  %1997 = vadd.xlane.f32.xlu1 %v1996_v15 }
 0x5ce   :  { %v2009_v2 = vpop.xlane.xlu0 %2008  ;;  %v1987_v24 = vpop.xlane.xlu1 %1986 }
 0x5cf   :  { %v2010_v31 = vsel %vm1852_vm12, %v2009_v2, 0.0  ;;  %v1988_v35 = vsel %vm1852_vm12, %v1987_v24, 0.0 }
 0x5d0   :  { %v2011_v32 = vrot.slane %v2010_v31, 4  ;;  %v1989_v7 = vrot.slane %v1988_v35, 4 }
 0x5d2   :  { %v2012_v34 = vadd.f32 %v2011_v32, %v2010_v31  ;;  %v1990_v27 = vadd.f32 %v1989_v7, %v1988_v35  ;;  %v1976_v28 = vpop.xlane.xlu0 %1975  ;;  %v1998_v41 = vpop.xlane.xlu1 %1997 }
 0x5d3   :  { %v1977_v5 = vrot.slane %v1976_v28, 4  ;;  %v1999_v12 = vrot.slane %v1998_v41, 4 }
 0x5d4   :  { %v2013_v39 = vrot.slane %v2012_v34, 2  ;;  %v1991_v18 = vrot.slane %v1990_v27, 2 }
 0x5d5   :  { %v1978_v21 = vadd.f32 %v1977_v5, %v1976_v28  ;;  %v2000_v61 = vadd.f32 %v1999_v12, %v1998_v41 }
 0x5d6   :  { %v2014_v17 = vadd.f32 %v2013_v39, %v2012_v34  ;;  %v1992_v20 = vadd.f32 %v1991_v18, %v1990_v27 }
 0x5d7   :  { %v1979_v47 = vrot.slane %v1978_v21, 2  ;;  %v2001_v58 = vrot.slane %v2000_v61, 2 }
 0x5d8   :  { %v2015_v52 = vrot.slane %v2014_v17, 1  ;;  %v1993_v6 = vrot.slane %v1992_v20, 1 }
 0x5d9   :  { %v1980_v56 = vadd.f32 %v1979_v47, %v1978_v21  ;;  %v2002_v37 = vadd.f32 %v2001_v58, %v2000_v61 }
 0x5da   :  { %v2016_v3 = vadd.f32 %v2015_v52, %v2014_v17  ;;  %v1994_v30 = vadd.f32 %v1993_v6, %v1992_v20 }
 0x5db   :  { %v1981_v22 = vrot.slane %v1980_v56, 1  ;;  %v2003_v54 = vrot.slane %v2002_v37, 1 }
 0x5dd   :  { %v1982_v60 = vadd.f32 %v1981_v22, %v1980_v56  ;;  %v2004_v53 = vadd.f32 %v2003_v54, %v2002_v37 }
 0x5df   :  { %v1995_v16 = vadd.f32 %v1994_v30, %v1982_v60  ;;  %v2017_v40 = vadd.f32 %v2016_v3, %v2004_v53 }
 0x5e1   :  { %v2018_v4 = vsel %vm76_vm0, %v1995_v16, %v2017_v40 }
 0x5e2   :  { %v2020_v62 = vadd.f32 %v2019_v19, %v2018_v4 }
 0x5e4   :  { %v2021_v13 = vand.u32 2147483647, %v2020_v62  ;;  %vm2028_vm15 = vcmp.ge.f32.partialorder %v2020_v62, 0.0 }
 0x5e6   :  { %v2022_v46 = vsub.f32 0.0, %v2021_v13 }
 0x5e8   :  { %v2023_v48 = vmul.f32 1.442695, %v2022_v46 }
 0x5ea   :  { %2088 = vpow2.f32 %v2023_v48 }
 0x5f7   :  { %v2089_v51 = vpop.eup %2088 }
 0x5f8   :  { %v2025_v0 = vadd.f32 1.0, %v2089_v51 }
 0x5fa   :  { %2090 = vrcp.f32 %v2025_v0 }
 0x607   :  { %v2091_v36 = vpop.eup %2090 }
 0x608   :  { %v2029_v26 = vsub.f32 1.0, %v2091_v36 }
 0x60a   :  { %v2030_v11 = vsel %vm2028_vm15, %v2091_v36, %v2029_v26 }
 0x60b   :  { %2032 = vst.msk [vmem:[%s3392_s2] sm:$0x3] %vm2031_vm14, %v2030_v11 }
 0x60c   :  { %2037 = vsyncpa [#allocation3], 1 }
 0x60d   :  { %2038 = vsyncpa [#allocation5], 1 }

</bundles_post_ra>
